<compile_context>
chip_gen: v5e
topology: v5e:2x2
jax: 0.10.0
libtpu: 0.0.40
codegen_flags: <defaults>
</compile_context>

<pallas_src>
import functools

import jax
import jax.numpy as jnp
from jax.experimental import pallas as pl
from jax.experimental.pallas import tpu as pltpu

FEATURES = 2
IN_DIM = 28 * 28          # 784
HID = 128
PAD_DIM = 896             # 7 * 128 -> lane-dense x / recon tiles


def _round_up(n, m):
    return ((n + m - 1) // m) * m


def vae_kernel(x_ref, w1_ref, b1_ref, w2_ref, b2_ref,
               w3_ref, b3_ref, w4_ref, b4_ref, out_ref):
    # x tile: (TB, 896) bf16.  Lanes [0,784) = image, [784,786) = eps noise,
    # [786,896) = zero padding.  w1 rows >= 784 are zero, so the eps/padding
    # lanes contribute nothing to the encoder matmul.
    x = x_ref[...]

    # ----- encoder: Linear(784->128)  [bf16 MXU, f32 accumulate] + ReLU -----
    h = jnp.dot(x, w1_ref[...], preferred_element_type=jnp.float32) + b1_ref[...]
    h = jnp.maximum(h, 0.0)

    # ----- encoder: Linear(128 -> 2*FEATURES)  (tiny, f32) -----
    enc = jnp.dot(h, w2_ref[...], preferred_element_type=jnp.float32) + b2_ref[...]

    # ----- repTrick: view(-1, 2, FEATURES); mu = [:,0,:], logvar = [:,1,:] -----
    mu = enc[:, 0:FEATURES]                                  # (TB, 2)
    logvar = enc[:, FEATURES:2 * FEATURES]                   # (TB, 2)
    eps = x[:, IN_DIM:IN_DIM + FEATURES].astype(jnp.float32)  # noise lanes
    sigma = jnp.exp(0.5 * logvar)
    z = mu + sigma * eps                                     # (TB, 2)

    # ----- decoder: Linear(2->128) as a VPU outer product (K=2, skip MXU) -----
    w3 = w3_ref[...]                                         # (2, 128)
    h2 = z[:, 0:1] * w3[0:1, :] + z[:, 1:2] * w3[1:2, :] + b3_ref[...]
    h2 = jnp.maximum(h2, 0.0)

    # ----- decoder: Linear(128->784) padded to 896 lanes  [bf16 MXU, f32 acc] -----
    logits = jnp.dot(h2.astype(jnp.bfloat16), w4_ref[...],
                     preferred_element_type=jnp.float32) + b4_ref[...]   # (TB, 896)

    # sigmoid(x) = 1 / (1 + exp(-x)); approx reciprocal stays on the EUP slot.
    recon = pl.reciprocal(1.0 + jnp.exp(-logits), approx=True)

    out_ref[...] = recon                                     # lane-dense store
    # pack [mu | logvar] into the spare lanes of the padded reconstruction
    out_ref[:, pl.ds(IN_DIM, 2 * FEATURES)] = enc


@functools.partial(jax.jit, static_argnames=("tb",))
def vae_forward(x, eps, params, *, tb=1024):
    """Returns (reconstruction, mu, logvar)."""
    B = x.shape[0]
    w1, b1, w2, b2, w3, b3, w4, b4 = params

    # ---- batch tile selection ----------------------------------------------
    b16 = _round_up(B, 16)                     # bf16 sublane packing granule
    tb = _round_up(max(16, min(tb, b16)), 16)
    if b16 > 16:
        # keep >= 2 grid steps so the batch axis can shard across TensorCores
        tb = min(tb, _round_up(pl.cdiv(b16, 2), 16))
    Bp = _round_up(B, tb)
    grid = (Bp // tb,)

    # ---- pack x (bf16) + eps into one lane-dense (Bp, 896) tile -------------
    xp = jnp.zeros((Bp, PAD_DIM), jnp.bfloat16)
    xp = xp.at[:B, :IN_DIM].set(x.astype(jnp.bfloat16))
    xp = xp.at[:B, IN_DIM:IN_DIM + FEATURES].set(eps.astype(jnp.bfloat16))

    # ---- zero-pad weights so both large matmuls are 896 lanes wide ----------
    w1p = jnp.zeros((PAD_DIM, HID), jnp.bfloat16).at[:IN_DIM, :].set(
        w1.astype(jnp.bfloat16))
    w4p = jnp.zeros((HID, PAD_DIM), jnp.bfloat16).at[:, :IN_DIM].set(
        w4.astype(jnp.bfloat16))
    b4p = jnp.zeros((1, PAD_DIM), jnp.float32).at[:, :IN_DIM].set(b4)

    weights = (w1p, b1, w2, b2, w3, b3, w4p, b4p)

    batch_in_spec = pl.BlockSpec((tb, PAD_DIM), lambda i: (i, 0))
    resident = lambda shape: pl.BlockSpec(shape, lambda i: (0, 0))
    in_specs = [batch_in_spec] + [resident(w.shape) for w in weights]
    out_specs = pl.BlockSpec((tb, PAD_DIM), lambda i: (i, 0))
    out_shape = jax.ShapeDtypeStruct((Bp, PAD_DIM), jnp.float32)

    # ---- VMEM budget (double-buffered tiles + resident weights) -------------
    weight_bytes = sum(int(a.size) * a.dtype.itemsize for a in weights)
    x_tile_bytes = tb * PAD_DIM * 2            # bf16 input tile
    out_tile_bytes = tb * PAD_DIM * 4          # f32 output tile
    vmem_limit = int(min(64 << 20,
                         max(32 << 20,
                             2 * (x_tile_bytes + out_tile_bytes)
                             + 2 * weight_bytes + (8 << 20))))

    cost = pl.CostEstimate(
        flops=2 * Bp * (PAD_DIM * HID + HID * 2 * FEATURES
                        + FEATURES * HID + HID * PAD_DIM),
        transcendentals=Bp * (PAD_DIM + FEATURES),
        bytes_accessed=int(xp.size) * 2 + weight_bytes + Bp * PAD_DIM * 4,
    )

    out = pl.pallas_call(
        vae_kernel,
        out_shape=out_shape,
        grid=grid,
        in_specs=in_specs,
        out_specs=out_specs,
        compiler_params=pltpu.CompilerParams(
            dimension_semantics=("parallel",),
            vmem_limit_bytes=vmem_limit),
        cost_estimate=cost,
    )(xp, *weights)

    recon = out[:B, :IN_DIM]
    mu = out[:B, IN_DIM:IN_DIM + FEATURES]
    logvar = out[:B, IN_DIM + FEATURES:IN_DIM + 2 * FEATURES]
    return recon, mu, logvar


def init_params(key):
    """Deterministic PyTorch-style (uniform +/- 1/sqrt(fan_in)) init.

    The two large weights (w1, w4) are stored in bf16; the rest stay f32.
    """
    def linear(key, fan_in, fan_out, w_dtype=jnp.float32):
        kw, kb = jax.random.split(key)
        bound = 1.0 / jnp.sqrt(fan_in)
        # stored as (fan_in, fan_out) so the kernel computes x @ W + b
        w = jax.random.uniform(kw, (fan_in, fan_out), jnp.float32, -bound, bound)
        b = jax.random.uniform(kb, (1, fan_out), jnp.float32, -bound, bound)
        return w.astype(w_dtype), b

    k1, k2, k3, k4 = jax.random.split(key, 4)
    w1, b1 = linear(k1, IN_DIM, HID, jnp.bfloat16)        # encoder[0]
    w2, b2 = linear(k2, HID, FEATURES * 2)                # encoder[2]
    w3, b3 = linear(k3, FEATURES, HID)                    # decoder[0]
    w4, b4 = linear(k4, HID, IN_DIM, jnp.bfloat16)        # decoder[2]
    return (w1, b1, w2, b2, w3, b3, w4, b4)


if __name__ == "__main__":
    key = jax.random.PRNGKey(0)
    k_params, k_x, k_eps = jax.random.split(key, 3)

    # B is deliberately NOT a tile multiple to exercise batch padding; the
    # default tb clamp produces a 2-step grid here.
    B = 40
    params = init_params(k_params)
    x = jax.random.uniform(k_x, (B, IN_DIM), jnp.float32)        # fake MNIST rows
    eps = jax.random.normal(k_eps, (B, FEATURES), jnp.float32)   # torch.randn_like(sigma)

    recon, mu, logvar = vae_forward(x, eps, params)
    jax.block_until_ready((recon, mu, logvar))

    assert recon.shape == (B, IN_DIM)
    assert mu.shape == (B, FEATURES) and logvar.shape == (B, FEATURES)

    # lightweight sanity check against a pure-JAX reference (same bf16 path)
    w1, b1, w2, b2, w3, b3, w4, b4 = params
    xb = x.astype(jnp.bfloat16)
    h = jnp.maximum(
        jnp.dot(xb, w1, preferred_element_type=jnp.float32) + b1, 0.0)
    enc = jnp.dot(h, w2, preferred_element_type=jnp.float32) + b2
    mu_ref = enc[:, :FEATURES]
    logvar_ref = enc[:, FEATURES:]
    eps_b = eps.astype(jnp.bfloat16).astype(jnp.float32)   # eps rides bf16 lanes
    z = mu_ref + jnp.exp(0.5 * logvar_ref) * eps_b
    h2 = jnp.maximum(z @ w3 + b3, 0.0)
    recon_ref = jax.nn.sigmoid(
        jnp.dot(h2.astype(jnp.bfloat16), w4, preferred_element_type=jnp.float32) + b4)

    assert jnp.allclose(recon, recon_ref, atol=2e-2), float(jnp.abs(recon - recon_ref).max())
    assert jnp.allclose(mu, mu_ref, atol=2e-2), float(jnp.abs(mu - mu_ref).max())
    assert jnp.allclose(logvar, logvar_ref, atol=2e-2), float(jnp.abs(logvar - logvar_ref).max())

    print("KERNEL_OK")
</pallas_src>

<mosaic_0001>
module attributes {stable_mosaic.version = 11 : i64} {
  func.func @vae_kernel(%arg0: i32, %arg1: memref<32x896xbf16, #tpu.memory_space<vmem>>, %arg2: memref<896x128xbf16, #tpu.memory_space<vmem>>, %arg3: memref<1x128xf32, #tpu.memory_space<vmem>>, %arg4: memref<128x4xf32, #tpu.memory_space<vmem>>, %arg5: memref<1x4xf32, #tpu.memory_space<vmem>>, %arg6: memref<2x128xf32, #tpu.memory_space<vmem>>, %arg7: memref<1x128xf32, #tpu.memory_space<vmem>>, %arg8: memref<128x896xbf16, #tpu.memory_space<vmem>>, %arg9: memref<1x896xf32, #tpu.memory_space<vmem>>, %arg10: memref<32x896xf32, #tpu.memory_space<vmem>>) attributes {dimension_semantics = [#tpu.dimension_semantics<parallel>], iteration_bounds = array<i64: 2>, scalar_prefetch = 0 : i64, scratch_operands = 0 : i64, tpu.core_type = #tpu.core_type<tc>, window_params = [{transform_indices = @transform_0, window_bounds = array<i64: 32, 896>}, {pipeline_mode = #tpu.pipeline_mode<synchronous>, transform_indices = @transform_1, window_bounds = array<i64: 896, 128>}, {pipeline_mode = #tpu.pipeline_mode<synchronous>, transform_indices = @transform_2, window_bounds = array<i64: 1, 128>}, {pipeline_mode = #tpu.pipeline_mode<synchronous>, transform_indices = @transform_3, window_bounds = array<i64: 128, 4>}, {pipeline_mode = #tpu.pipeline_mode<synchronous>, transform_indices = @transform_4, window_bounds = array<i64: 1, 4>}, {pipeline_mode = #tpu.pipeline_mode<synchronous>, transform_indices = @transform_5, window_bounds = array<i64: 2, 128>}, {pipeline_mode = #tpu.pipeline_mode<synchronous>, transform_indices = @transform_6, window_bounds = array<i64: 1, 128>}, {pipeline_mode = #tpu.pipeline_mode<synchronous>, transform_indices = @transform_7, window_bounds = array<i64: 128, 896>}, {pipeline_mode = #tpu.pipeline_mode<synchronous>, transform_indices = @transform_8, window_bounds = array<i64: 1, 896>}, {transform_indices = @transform_9, window_bounds = array<i64: 32, 896>}]} {
    %c0 = arith.constant 0 : index
    %c0_0 = arith.constant 0 : index
    %0 = vector.load %arg1[%c0, %c0_0] : memref<32x896xbf16, #tpu.memory_space<vmem>>, vector<32x896xbf16>
    %c0_1 = arith.constant 0 : index
    %c0_2 = arith.constant 0 : index
    %1 = vector.load %arg2[%c0_1, %c0_2] : memref<896x128xbf16, #tpu.memory_space<vmem>>, vector<896x128xbf16>
    %cst = arith.constant dense<0.000000e+00> : vector<32x128xf32>
    %2 = tpu.matmul %0, %1, %cst {dimension_numbers = #tpu.dot_dimension_numbers<[1], [0], [0], [1], [0, 0, 1, 1], [], []>} : vector<32x896xbf16>, vector<896x128xbf16>, vector<32x128xf32> -> vector<32x128xf32>
    %c0_3 = arith.constant 0 : index
    %c0_4 = arith.constant 0 : index
    %3 = vector.load %arg3[%c0_3, %c0_4] : memref<1x128xf32, #tpu.memory_space<vmem>>, vector<1x128xf32>
    %4 = vector.broadcast %3 : vector<1x128xf32> to vector<32x128xf32>
    %5 = arith.addf %2, %4 : vector<32x128xf32>
    %cst_5 = arith.constant 0.000000e+00 : f32
    %6 = vector.broadcast %cst_5 : f32 to vector<32x128xf32>
    %7 = arith.maximumf %5, %6 : vector<32x128xf32>
    %c0_6 = arith.constant 0 : index
    %c0_7 = arith.constant 0 : index
    %8 = vector.load %arg4[%c0_6, %c0_7] : memref<128x4xf32, #tpu.memory_space<vmem>>, vector<128x4xf32>
    %cst_8 = arith.constant dense<0.000000e+00> : vector<32x4xf32>
    %9 = tpu.matmul %7, %8, %cst_8 {dimension_numbers = #tpu.dot_dimension_numbers<[1], [0], [0], [1], [0, 0, 1, 1], [], []>} : vector<32x128xf32>, vector<128x4xf32>, vector<32x4xf32> -> vector<32x4xf32>
    %c0_9 = arith.constant 0 : index
    %c0_10 = arith.constant 0 : index
    %10 = vector.load %arg5[%c0_9, %c0_10] : memref<1x4xf32, #tpu.memory_space<vmem>>, vector<1x4xf32>
    %11 = vector.broadcast %10 : vector<1x4xf32> to vector<32x4xf32>
    %12 = arith.addf %9, %11 : vector<32x4xf32>
    %13 = vector.extract_strided_slice %12 {offsets = [0, 0], sizes = [32, 2], strides = [1, 1]} : vector<32x4xf32> to vector<32x2xf32>
    %14 = vector.extract_strided_slice %12 {offsets = [0, 2], sizes = [32, 2], strides = [1, 1]} : vector<32x4xf32> to vector<32x2xf32>
    %15 = vector.extract_strided_slice %0 {offsets = [0, 784], sizes = [32, 2], strides = [1, 1]} : vector<32x896xbf16> to vector<32x2xbf16>
    %16 = arith.extf %15 : vector<32x2xbf16> to vector<32x2xf32>
    %cst_11 = arith.constant 5.000000e-01 : f32
    %17 = vector.broadcast %cst_11 : f32 to vector<32x2xf32>
    %18 = arith.mulf %17, %14 : vector<32x2xf32>
    %19 = math.exp %18 : vector<32x2xf32>
    %20 = arith.mulf %19, %16 : vector<32x2xf32>
    %21 = arith.addf %13, %20 : vector<32x2xf32>
    %c0_12 = arith.constant 0 : index
    %c0_13 = arith.constant 0 : index
    %22 = vector.load %arg6[%c0_12, %c0_13] : memref<2x128xf32, #tpu.memory_space<vmem>>, vector<2x128xf32>
    %23 = vector.extract_strided_slice %21 {offsets = [0, 0], sizes = [32, 1], strides = [1, 1]} : vector<32x2xf32> to vector<32x1xf32>
    %24 = vector.extract_strided_slice %22 {offsets = [0, 0], sizes = [1, 128], strides = [1, 1]} : vector<2x128xf32> to vector<1x128xf32>
    %25 = vector.broadcast %23 : vector<32x1xf32> to vector<32x128xf32>
    %26 = vector.broadcast %24 : vector<1x128xf32> to vector<32x128xf32>
    %27 = arith.mulf %25, %26 : vector<32x128xf32>
    %28 = vector.extract_strided_slice %21 {offsets = [0, 1], sizes = [32, 1], strides = [1, 1]} : vector<32x2xf32> to vector<32x1xf32>
    %29 = vector.extract_strided_slice %22 {offsets = [1, 0], sizes = [1, 128], strides = [1, 1]} : vector<2x128xf32> to vector<1x128xf32>
    %30 = vector.broadcast %28 : vector<32x1xf32> to vector<32x128xf32>
    %31 = vector.broadcast %29 : vector<1x128xf32> to vector<32x128xf32>
    %32 = arith.mulf %30, %31 : vector<32x128xf32>
    %33 = arith.addf %27, %32 : vector<32x128xf32>
    %c0_14 = arith.constant 0 : index
    %c0_15 = arith.constant 0 : index
    %34 = vector.load %arg7[%c0_14, %c0_15] : memref<1x128xf32, #tpu.memory_space<vmem>>, vector<1x128xf32>
    %35 = vector.broadcast %34 : vector<1x128xf32> to vector<32x128xf32>
    %36 = arith.addf %33, %35 : vector<32x128xf32>
    %cst_16 = arith.constant 0.000000e+00 : f32
    %37 = vector.broadcast %cst_16 : f32 to vector<32x128xf32>
    %38 = arith.maximumf %36, %37 : vector<32x128xf32>
    %39 = arith.truncf %38 : vector<32x128xf32> to vector<32x128xbf16>
    %c0_17 = arith.constant 0 : index
    %c0_18 = arith.constant 0 : index
    %40 = vector.load %arg8[%c0_17, %c0_18] : memref<128x896xbf16, #tpu.memory_space<vmem>>, vector<128x896xbf16>
    %cst_19 = arith.constant dense<0.000000e+00> : vector<32x896xf32>
    %41 = tpu.matmul %39, %40, %cst_19 {dimension_numbers = #tpu.dot_dimension_numbers<[1], [0], [0], [1], [0, 0, 1, 1], [], []>} : vector<32x128xbf16>, vector<128x896xbf16>, vector<32x896xf32> -> vector<32x896xf32>
    %c0_20 = arith.constant 0 : index
    %c0_21 = arith.constant 0 : index
    %42 = vector.load %arg9[%c0_20, %c0_21] : memref<1x896xf32, #tpu.memory_space<vmem>>, vector<1x896xf32>
    %43 = vector.broadcast %42 : vector<1x896xf32> to vector<32x896xf32>
    %44 = arith.addf %41, %43 : vector<32x896xf32>
    %cst_22 = arith.constant 0.000000e+00 : f32
    %45 = vector.broadcast %cst_22 : f32 to vector<32x896xf32>
    %46 = arith.subf %45, %44 : vector<32x896xf32>
    %47 = math.exp %46 : vector<32x896xf32>
    %cst_23 = arith.constant 1.000000e+00 : f32
    %48 = vector.broadcast %cst_23 : f32 to vector<32x896xf32>
    %49 = arith.addf %48, %47 : vector<32x896xf32>
    %50 = tpu.reciprocal %49 {approx = true} : vector<32x896xf32> -> vector<32x896xf32>
    %c0_24 = arith.constant 0 : index
    %c0_25 = arith.constant 0 : index
    %51 = vector.load %arg10[%c0_24, %c0_25] : memref<32x896xf32, #tpu.memory_space<vmem>>, vector<32x896xf32>
    tpu.vector_store %arg10[%c0_24, %c0_25], %50 {strides = array<i32>} : memref<32x896xf32, #tpu.memory_space<vmem>>, vector<32x896xf32>,
    %c0_26 = arith.constant 0 : index
    %c784 = arith.constant 784 : index
    %52 = vector.load %arg10[%c0_26, %c784] : memref<32x896xf32, #tpu.memory_space<vmem>>, vector<32x4xf32>
    tpu.vector_store %arg10[%c0_26, %c784], %12 {strides = array<i32>} : memref<32x896xf32, #tpu.memory_space<vmem>>, vector<32x4xf32>,
    return
  }
  func.func @transform_0(%arg0: i32) -> (i32, i32) {
    %c0_i32 = arith.constant 0 : i32
    %c0_i32_0 = arith.constant 0 : i32
    return %arg0, %c0_i32 : i32, i32
  }
  func.func @transform_1(%arg0: i32) -> (i32, i32) {
    %c0_i32 = arith.constant 0 : i32
    %c0_i32_0 = arith.constant 0 : i32
    %c0_i32_1 = arith.constant 0 : i32
    return %c0_i32, %c0_i32_0 : i32, i32
  }
  func.func @transform_2(%arg0: i32) -> (i32, i32) {
    %c0_i32 = arith.constant 0 : i32
    %c0_i32_0 = arith.constant 0 : i32
    %c0_i32_1 = arith.constant 0 : i32
    return %c0_i32, %c0_i32_0 : i32, i32
  }
  func.func @transform_3(%arg0: i32) -> (i32, i32) {
    %c0_i32 = arith.constant 0 : i32
    %c0_i32_0 = arith.constant 0 : i32
    %c0_i32_1 = arith.constant 0 : i32
    return %c0_i32, %c0_i32_0 : i32, i32
  }
  func.func @transform_4(%arg0: i32) -> (i32, i32) {
    %c0_i32 = arith.constant 0 : i32
    %c0_i32_0 = arith.constant 0 : i32
    %c0_i32_1 = arith.constant 0 : i32
    return %c0_i32, %c0_i32_0 : i32, i32
  }
  func.func @transform_5(%arg0: i32) -> (i32, i32) {
    %c0_i32 = arith.constant 0 : i32
    %c0_i32_0 = arith.constant 0 : i32
    %c0_i32_1 = arith.constant 0 : i32
    return %c0_i32, %c0_i32_0 : i32, i32
  }
  func.func @transform_6(%arg0: i32) -> (i32, i32) {
    %c0_i32 = arith.constant 0 : i32
    %c0_i32_0 = arith.constant 0 : i32
    %c0_i32_1 = arith.constant 0 : i32
    return %c0_i32, %c0_i32_0 : i32, i32
  }
  func.func @transform_7(%arg0: i32) -> (i32, i32) {
    %c0_i32 = arith.constant 0 : i32
    %c0_i32_0 = arith.constant 0 : i32
    %c0_i32_1 = arith.constant 0 : i32
    return %c0_i32, %c0_i32_0 : i32, i32
  }
  func.func @transform_8(%arg0: i32) -> (i32, i32) {
    %c0_i32 = arith.constant 0 : i32
    %c0_i32_0 = arith.constant 0 : i32
    %c0_i32_1 = arith.constant 0 : i32
    return %c0_i32, %c0_i32_0 : i32, i32
  }
  func.func @transform_9(%arg0: i32) -> (i32, i32) {
    %c0_i32 = arith.constant 0 : i32
    %c0_i32_0 = arith.constant 0 : i32
    return %arg0, %c0_i32 : i32, i32
  }
}

</mosaic_0001>

<bundles_post_ra>
// kernel: vae_forward.1
= control target key start
LH: loop header
LB: loop body
LE: loop exit
PB: predicated region body
PF: predicated region fallthrough
CT: control target
= control target key end

     0   :  { %s2803_s30 = smov 0   ;;  %s3522_s0 = inlined_call_operand.vmem [shape: bf16[64,896], index: 0, kind: input, shape index: {}]   ;;  %s3523_s1 = inlined_call_operand.vmem [shape: bf16[896,128], index: 1, kind: input, shape index: {}]   ;;  %s3524_s2 = inlined_call_operand.vmem [shape: f32[1,128], index: 2, kind: input, shape index: {}]   ;;  %s3525_s3 = inlined_call_operand.vmem [shape: f32[128,4], index: 3, kind: input, shape index: {}]   ;;  %s3526_s4 = inlined_call_operand.vmem [shape: f32[1,4], index: 4, kind: input, shape index: {}]   ;;  %s3527_s5 = inlined_call_operand.vmem [shape: f32[2,128], index: 5, kind: input, shape index: {}]   ;;  %s3528_s6 = inlined_call_operand.vmem [shape: f32[1,128], index: 6, kind: input, shape index: {}]   ;;  %s3529_s7 = inlined_call_operand.vmem [shape: bf16[128,896], index: 7, kind: input, shape index: {}]   ;;  %s3530_s8 = inlined_call_operand.vmem [shape: f32[1,896], index: 8, kind: input, shape index: {}]   ;;  %s3531_s9 = inlined_call_operand.vmem [shape: f32[64,896], index: 9, kind: output, shape index: {}]  }
   0x1 LB: > { %s1936_s10 = sadd.s32 4294967295, %s2746_s30   ;;  %p1940_p0 = scmp.ge.s32.totalorder %s2746_s30, 1  ;;  %s2746_s30 = sphi %s2803_s30, %s19_s30  }
   0x2   : > { %p289_p1 = scmp.lt.s32.totalorder %s2746_s30, 3 }
   0x4   : > { %p290_p2 = pnand %p1940_p0, %p289_p1 }
   0x5   : > { %s1941_s16 = sshll.u32 (!%p290_p2), %s1936_s10, 2  ;;  %s2748_s14 = smov (!%p290_p2), 114  }
   0x6   : > { %293 = sbr.rel (%p290_p2) target bundleno = 836 (0x344), region = 56  ;;  %p328_p3 = scmp.lt.s32.totalorder (!%p290_p2), %s1941_s16, 7 }
   0x7   : > { %s2749_s17 = smov (!%p290_p2), 126  }
   0xb   : > { %v2472_v0 = vld [vmem:[%s3523_s1 + $0x38] sm:$0xff]  ;;  %v2471_v4 = vld [vmem:[%s3523_s1 + $0x30] sm:$0xff]  ;;  %v2470_v8 = vld [vmem:[%s3523_s1 + $0x28] sm:$0xff]  ;;  %s3533_s16 = smov (!%p328_p3, %s1941_s16), 7  ;;  %vm1873_vm0 = vcmask 162944  }
   0xc   : > { %v2480_v1 = vld [vmem:[%s3523_s1 + $0x78] sm:$0xff]  ;;  %881 = vmatpush.bf16.msra.mxu0 %v2472_v0  ;;  %v2479_v5 = vld [vmem:[%s3523_s1 + $0x70] sm:$0xff]  ;;  %v2478_v9 = vld [vmem:[%s3523_s1 + $0x68] sm:$0xff]  ;;  %s2585_s18 = smul.u32 28, %s3533_s16 }
   0xd   : > { %v2488_v2 = vld [vmem:[%s3523_s1 + $0xb8] sm:$0xff]  ;;  %900 = vmatpush.bf16.msra.mxu1 %v2480_v1  ;;  %v2487_v6 = vld [vmem:[%s3523_s1 + $0xb0] sm:$0xff]  ;;  %v2486_v10 = vld [vmem:[%s3523_s1 + $0xa8] sm:$0xff]  ;;  %s2586_s21 = smul.u32 56, %s3533_s16 }
   0xe   : > { %v2496_v3 = vld [vmem:[%s3523_s1 + $0xf8] sm:$0xff]  ;;  %919 = vmatpush.bf16.msra.mxu2 %v2488_v2  ;;  %v2495_v7 = vld [vmem:[%s3523_s1 + $0xf0] sm:$0xff]  ;;  %v2494_v11 = vld [vmem:[%s3523_s1 + $0xe8] sm:$0xff]  ;;  %s2895_s28 = scalar_lea.vmem %s3522_s0, %s2585_s18  ;;  %s2752_s18 = smov 16  }
   0xf   : > { %938 = vmatpush.bf16.msra.mxu3 %v2496_v3  ;;  %v2469_v12 = vld [vmem:[%s3523_s1 + $0x20] sm:$0xff]  ;;  %v2468_v16 = vld [vmem:[%s3523_s1 + $0x18] sm:$0xff]  ;;  %v2467_v20 = vld [vmem:[%s3523_s1 + $0x10] sm:$0xff]  ;;  %s3458_s23 = scalar_lea.vmem %s3531_s9, %s2586_s21 }
  0x10   : > { %882 = vmatpush.bf16.msra.mxu0 %v2471_v4  ;;  %v2477_v13 = vld [vmem:[%s3523_s1 + $0x60] sm:$0xff]  ;;  %v2476_v17 = vld [vmem:[%s3523_s1 + $0x58] sm:$0xff]  ;;  %v2475_v21 = vld [vmem:[%s3523_s1 + $0x50] sm:$0xff] }
  0x11   : > { %901 = vmatpush.bf16.msra.mxu1 %v2479_v5  ;;  %v2485_v14 = vld [vmem:[%s3523_s1 + $0xa0] sm:$0xff]  ;;  %v2484_v18 = vld [vmem:[%s3523_s1 + $0x98] sm:$0xff]  ;;  %v2483_v22 = vld [vmem:[%s3523_s1 + $0x90] sm:$0xff] }
  0x12   : > { %920 = vmatpush.bf16.msra.mxu2 %v2487_v6  ;;  %v2493_v15 = vld [vmem:[%s3523_s1 + $0xe0] sm:$0xff]  ;;  %v2492_v19 = vld [vmem:[%s3523_s1 + $0xd8] sm:$0xff]  ;;  %v2491_v23 = vld [vmem:[%s3523_s1 + $0xd0] sm:$0xff] }
  0x13   : > { %939 = vmatpush.bf16.msra.mxu3 %v2495_v7  ;;  %v2466_v24 = vld [vmem:[%s3523_s1 + $0x8] sm:$0xff]  ;;  %v2465_v28 = vld [vmem:[%s3523_s1] sm:$0xff]  ;;  %v2454_v33 = vld [vmem:[%s2895_s28 + $0x18] sm:$0xf0] }
  0x14   : > { %883 = vmatpush.bf16.msra.mxu0 %v2470_v8  ;;  %v2474_v25 = vld [vmem:[%s3523_s1 + $0x48] sm:$0xff]  ;;  %v2473_v29 = vld [vmem:[%s3523_s1 + $0x40] sm:$0xff]  ;;  %v2520_v38 = vld [vmem:[%s3523_s1 + $0x1b8] sm:$0xff] }
  0x15   : > { %902 = vmatpush.bf16.msra.mxu1 %v2478_v9  ;;  %v2482_v26 = vld [vmem:[%s3523_s1 + $0x88] sm:$0xff]  ;;  %v2481_v30 = vld [vmem:[%s3523_s1 + $0x80] sm:$0xff]  ;;  %v2504_v39 = vld [vmem:[%s3523_s1 + $0x138] sm:$0xff] }
  0x16   : > { %921 = vmatpush.bf16.msra.mxu2 %v2486_v10  ;;  %v2490_v27 = vld [vmem:[%s3523_s1 + $0xc8] sm:$0xff]  ;;  %v2489_v31 = vld [vmem:[%s3523_s1 + $0xc0] sm:$0xff]  ;;  %v2512_v45 = vld [vmem:[%s3523_s1 + $0x178] sm:$0xff] }
  0x17   : > { %940 = vmatpush.bf16.msra.mxu3 %v2494_v11  ;;  %v1947_v32 = vld [vmem:[%s2895_s28] sm:$0xf]  ;;  %v2451_v34 = vld [vmem:[%s2895_s28 + $0x4] sm:$0xf]  ;;  %v1955_v36 = vld [vmem:[%s2895_s28 + $0x8] sm:$0xf] }
  0x18   : > { %884 = vmatpush.bf16.msra.mxu0 %v2469_v12  ;;  %v1949_v35 = vld [vmem:[%s2895_s28 + $0x1c] sm:$0xf0]  ;;  %v2455_v37 = vld [vmem:[%s2895_s28 + $0x20] sm:$0xf0]  ;;  %v2452_v40 = vld [vmem:[%s2895_s28 + $0xc] sm:$0xf]  ;;  %v1948_v42 = vor.u32 %v2454_v33, %v1947_v32 }
  0x19   : > { %903 = vmatpush.bf16.msra.mxu1 %v2477_v13  ;;  %v1957_v41 = vld [vmem:[%s2895_s28 + $0x24] sm:$0xf0]  ;;  %v1952_v43 = vor.u32 %v2451_v34, %v1949_v35  ;;  %v1956_v44 = vor.u32 %v2455_v37, %v1955_v36  ;;  %v2519_v47 = vld [vmem:[%s3523_s1 + $0x1b0] sm:$0xff]  ;;  %v2517_v53 = vld [vmem:[%s3523_s1 + $0x1a0] sm:$0xff] }
  0x1a   : > { %922 = vmatpush.bf16.msra.mxu2 %v2485_v14  ;;  %v1960_v46 = vor.u32 %v2452_v40, %v1957_v41  ;;  %v2503_v48 = vld [vmem:[%s3523_s1 + $0x130] sm:$0xff]  ;;  %v2518_v50 = vld [vmem:[%s3523_s1 + $0x1a8] sm:$0xff]  ;;  %v2501_v54 = vld [vmem:[%s3523_s1 + $0x120] sm:$0xff] }
  0x1b   : > { %941 = vmatpush.bf16.msra.mxu3 %v2493_v15  ;;  %v2511_v49 = vld [vmem:[%s3523_s1 + $0x170] sm:$0xff]  ;;  %v2502_v51 = vld [vmem:[%s3523_s1 + $0x128] sm:$0xff]  ;;  %v2509_v55 = vld [vmem:[%s3523_s1 + $0x160] sm:$0xff] }
  0x1c   : > { %885 = vmatpush.bf16.msra.mxu0 %v2468_v16  ;;  %v2510_v52 = vld [vmem:[%s3523_s1 + $0x168] sm:$0xff]  ;;  %v1975_v56 = vld [vmem:[%s2895_s28 + $0x38] sm:$0xf]  ;;  %v2461_v57 = vld [vmem:[%s2895_s28 + $0x50] sm:$0xf0] }
  0x1d   : > { %904 = vmatpush.bf16.msra.mxu1 %v2476_v17  ;;  %v2458_v58 = vld [vmem:[%s2895_s28 + $0x3c] sm:$0xf]  ;;  %v1977_v59 = vld [vmem:[%s2895_s28 + $0x54] sm:$0xf0]  ;;  %v1983_v60 = vld [vmem:[%s2895_s28 + $0x40] sm:$0xf]  ;;  %v1976_v2 = vor.u32 %v2461_v57, %v1975_v56 }
  0x1e   : > { %923 = vmatpush.bf16.msra.mxu2 %v2484_v18  ;;  %v2462_v61 = vld [vmem:[%s2895_s28 + $0x58] sm:$0xf0]  ;;  %v2459_v0 = vld [vmem:[%s2895_s28 + $0x44] sm:$0xf]  ;;  %v1985_v1 = vld [vmem:[%s2895_s28 + $0x5c] sm:$0xf0]  ;;  %v1980_v3 = vor.u32 %v2458_v58, %v1977_v59 }
  0x1f   : > { %942 = vmatpush.bf16.msra.mxu3 %v2492_v19  ;;  %v2516_v62 = vld [vmem:[%s3523_s1 + $0x198] sm:$0xff]  ;;  %v1984_v4 = vor.u32 %v2462_v61, %v1983_v60  ;;  %v1988_v6 = vor.u32 %v2459_v0, %v1985_v1  ;;  %v2515_v7 = vld [vmem:[%s3523_s1 + $0x190] sm:$0xff]  ;;  %v2514_v10 = vld [vmem:[%s3523_s1 + $0x188] sm:$0xff] }
  0x20   : > { %886 = vmatpush.bf16.msra.mxu0 %v2467_v20  ;;  %v2500_v63 = vld [vmem:[%s3523_s1 + $0x118] sm:$0xff]  ;;  %v2499_v8 = vld [vmem:[%s3523_s1 + $0x110] sm:$0xff]  ;;  %v2498_v11 = vld [vmem:[%s3523_s1 + $0x108] sm:$0xff] }
  0x21   : > { %905 = vmatpush.bf16.msra.mxu1 %v2475_v21  ;;  %v2508_v5 = vld [vmem:[%s3523_s1 + $0x158] sm:$0xff]  ;;  %v2507_v9 = vld [vmem:[%s3523_s1 + $0x150] sm:$0xff]  ;;  %v2506_v12 = vld [vmem:[%s3523_s1 + $0x148] sm:$0xff] }
  0x22   : > { %924 = vmatpush.bf16.msra.mxu2 %v2483_v22  ;;  %v2513_v13 = vld [vmem:[%s3523_s1 + $0x180] sm:$0xff]  ;;  %v1963_v16 = vld [vmem:[%s2895_s28 + $0x10] sm:$0xf]  ;;  %v2456_v17 = vld [vmem:[%s2895_s28 + $0x28] sm:$0xf0] }
  0x23   : > { %943 = vmatpush.bf16.msra.mxu3 %v2491_v23  ;;  %v2497_v14 = vld [vmem:[%s3523_s1 + $0x100] sm:$0xff]  ;;  %v2453_v18 = vld [vmem:[%s2895_s28 + $0x14] sm:$0xf]  ;;  %v1965_v19 = vld [vmem:[%s2895_s28 + $0x2c] sm:$0xf0]  ;;  %v1964_v22 = vor.u32 %v2456_v17, %v1963_v16 }
  0x24   : > { %887 = vmatpush.bf16.msra.mxu0 %v2466_v24  ;;  %v2505_v15 = vld [vmem:[%s3523_s1 + $0x140] sm:$0xff]  ;;  %v1971_v20 = vld [vmem:[%s2895_s28 + $0x18] sm:$0xf]  ;;  %v2457_v21 = vld [vmem:[%s2895_s28 + $0x30] sm:$0xf0]  ;;  %v1968_v23 = vor.u32 %v2453_v18, %v1965_v19 }
  0x25   : > { %906 = vmatpush.bf16.msra.mxu1 %v2474_v25  ;;  %v1972_v24 = vor.u32 %v2457_v21, %v1971_v20  ;;  %v1991_v25 = vld [vmem:[%s2895_s28 + $0x48] sm:$0xf]  ;;  %v1033_v34 = vld [vmem:[%s3525_s3 + $0x78] sm:$0xff]  ;;  %v1032_v35 = vld [vmem:[%s3525_s3 + $0x70] sm:$0xff] }
  0x26   : > { %925 = vmatpush.bf16.msra.mxu2 %v2482_v26  ;;  %v2463_v26 = vld [vmem:[%s2895_s28 + $0x60] sm:$0xf0]  ;;  %v1031_v36 = vld [vmem:[%s3525_s3 + $0x68] sm:$0xff]  ;;  %v2617_v56 = vld [vmem:[%s3524_s2] ss:$0 sm:$0xff] }
  0x27   : > { %944 = vmatpush.bf16.msra.mxu3 %v2490_v27  ;;  %v2460_v27 = vld [vmem:[%s2895_s28 + $0x4c] sm:$0xf]  ;;  %v1030_v37 = vld [vmem:[%s3525_s3 + $0x60] sm:$0xff]  ;;  %v352_v16 = vld [vmem:[%s2895_s28 + $0x50] sm:$0xf] }
  0x28   : > { %888 = vmatpush.bf16.msra.mxu0 %v2465_v28  ;;  %v1993_v28 = vld [vmem:[%s2895_s28 + $0x64] sm:$0xf0]  ;;  %v1026_v41 = vld [vmem:[%s3525_s3 + $0x40] sm:$0xff]  ;;  %v356_v17 = vld [vmem:[%s2895_s28 + $0x6c] sm:$0xf] }
  0x29   : > { %907 = vmatpush.bf16.msra.mxu1 %v2473_v29  ;;  %v1999_v29 = vld [vmem:[%s2895_s28 + $0x50] sm:$0xf]  ;;  %v1996_v32 = vor.u32 %v2460_v27, %v1993_v28  ;;  %v1027_v40 = vld [vmem:[%s3525_s3 + $0x48] sm:$0xff] }
  0x2a   : > { %926 = vmatpush.bf16.msra.mxu2 %v2481_v30  ;;  %v2464_v30 = vld [vmem:[%s2895_s28 + $0x68] sm:$0xf0] }
  0x2b   : > { %945 = vmatpush.bf16.msra.mxu3 %v2489_v31  ;;  %889 = vmatmul.bf16.vlgmr.msra.gmra.mxu0 %v1948_v42  ;;  %v1992_v31 = vor.u32 %v2463_v26, %v1991_v25  ;;  %v2000_v33 = vor.u32 %v2464_v30, %v1999_v29  ;;  %v1025_v42 = vld [vmem:[%s3525_s3 + $0x38] sm:$0xff]  ;;  %v1069_v25 = vunpack.c.l.bf16 %v352_v16  ;;  %v1070_v26 = vunpack.c.l.bf16 %v356_v17 }
  0x2c   : > { %957 = vmatpush.bf16.msrb.mxu0 %v2504_v39  ;;  %908 = vmatmul.bf16.vlgmr.msra.gmra.mxu1 %v1952_v43  ;;  %v1028_v39 = vld [vmem:[%s3525_s3 + $0x50] sm:$0xff] }
  0x2d   : > { %927 = vmatmul.bf16.vlgmr.msra.gmra.mxu2 %v1956_v44  ;;  %976 = vmatpush.bf16.msrb.mxu1 %v2512_v45  ;;  %v1024_v43 = vld [vmem:[%s3525_s3 + $0x30] sm:$0xff] }
  0x2e   : > { %995 = vmatpush.bf16.msrb.mxu2 %v2520_v38  ;;  %946 = vmatmul.bf16.vlgmr.msra.gmra.mxu3 %v1960_v46  ;;  %v1029_v38 = vld [vmem:[%s3525_s3 + $0x58] sm:$0xff]  ;;  %v1023_v46 = vld [vmem:[%s3525_s3 + $0x28] sm:$0xff] }
  0x2f   : > { %1038 = vmatpush.msrb.mxu3 %v1033_v34 }
  0x30   : > { %958 = vmatpush.bf16.msrb.mxu0 %v2503_v48  ;;  %v1021_v48 = vld [vmem:[%s3525_s3 + $0x18] sm:$0xff] }
  0x31   : > { %977 = vmatpush.bf16.msrb.mxu1 %v2511_v49  ;;  %1039 = vmatpush.msrb.mxu3 %v1032_v35  ;;  %v1020_v49 = vld [vmem:[%s3525_s3 + $0x10] sm:$0xff] }
  0x32   : > { %996 = vmatpush.bf16.msrb.mxu2 %v2519_v47  ;;  %v1022_v47 = vld [vmem:[%s3525_s3 + $0x20] sm:$0xff] }
  0x33   : > { %1040 = vmatpush.msrb.mxu3 %v1031_v36 }
  0x34   : > { %959 = vmatpush.bf16.msrb.mxu0 %v2502_v51 }
  0x35   : > { %978 = vmatpush.bf16.msrb.mxu1 %v2510_v52  ;;  %1041 = vmatpush.msrb.mxu3 %v1030_v37 }
  0x36   : > { %997 = vmatpush.bf16.msrb.mxu2 %v2518_v50 }
  0x37   : > { %1042 = vmatpush.msrb.mxu3 %v1029_v38 }
  0x38   : > { %960 = vmatpush.bf16.msrb.mxu0 %v2501_v54  ;;  %v1018_v54 = vld [vmem:[%s3525_s3] sm:$0xff] }
  0x39   : > { %979 = vmatpush.bf16.msrb.mxu1 %v2509_v55  ;;  %1043 = vmatpush.msrb.mxu3 %v1028_v39 }
  0x3a   : > { %998 = vmatpush.bf16.msrb.mxu2 %v2517_v53  ;;  %v1019_v53 = vld [vmem:[%s3525_s3 + $0x8] sm:$0xff] }
  0x3b   : > { %894 = vmatmul.bf16.gmra.mxu0 %v1976_v2  ;;  %1044 = vmatpush.msrb.mxu3 %v1027_v40 }
  0x3c   : > { %961 = vmatpush.bf16.msrb.mxu0 %v2500_v63  ;;  %913 = vmatmul.bf16.gmra.mxu1 %v1980_v3 }
  0x3d   : > { %932 = vmatmul.bf16.gmra.mxu2 %v1984_v4  ;;  %980 = vmatpush.bf16.msrb.mxu1 %v2508_v5 }
  0x3e   : > { %999 = vmatpush.bf16.msrb.mxu2 %v2516_v62  ;;  %951 = vmatmul.bf16.gmra.mxu3 %v1988_v6 }
  0x3f   : > { %1045 = vmatpush.msrb.mxu3 %v1026_v41 }
  0x40   : > { %962 = vmatpush.bf16.msrb.mxu0 %v2499_v8 }
  0x41   : > { %981 = vmatpush.bf16.msrb.mxu1 %v2507_v9  ;;  %1046 = vmatpush.msrb.mxu3 %v1025_v42 }
  0x42   : > { %1000 = vmatpush.bf16.msrb.mxu2 %v2515_v7 }
  0x43   : > { %1047 = vmatpush.msrb.mxu3 %v1024_v43 }
  0x44   : > { %963 = vmatpush.bf16.msrb.mxu0 %v2498_v11  ;;  %v344_v11 = vld [vmem:[%s2895_s28 + $0x18] sm:$0xf] }
  0x45   : > { %982 = vmatpush.bf16.msrb.mxu1 %v2506_v12  ;;  %1048 = vmatpush.msrb.mxu3 %v1023_v46  ;;  %v348_v12 = vld [vmem:[%s2895_s28 + $0x34] sm:$0xf] }
  0x46   : > { %1001 = vmatpush.bf16.msrb.mxu2 %v2514_v10 }
  0x47   : > { %1049 = vmatpush.msrb.mxu3 %v1022_v47 }
  0x48   : > { %964 = vmatpush.bf16.msrb.mxu0 %v2497_v14  ;;  %v1067_v14 = vunpack.c.l.bf16 %v344_v11 }
  0x49   : > { %983 = vmatpush.bf16.msrb.mxu1 %v2505_v15  ;;  %1050 = vmatpush.msrb.mxu3 %v1021_v48  ;;  %v1068_v15 = vunpack.c.l.bf16 %v348_v12 }
  0x4a   : > { %1002 = vmatpush.bf16.msrb.mxu2 %v2513_v13 }
  0x4b   : > { %965 = vmatmul.bf16.vlgmr.msrb.gmra.mxu0 %v1964_v22  ;;  %1051 = vmatpush.msrb.mxu3 %v1020_v49  ;;  %v2600_v19 = vpack.i.bf16 %v1068_v15, %v1067_v14 }
  0x4c   : > { %984 = vmatmul.bf16.vlgmr.msrb.gmra.mxu1 %v1968_v23 }
  0x4d   : > { %1003 = vmatmul.bf16.vlgmr.msrb.gmra.mxu2 %v1972_v24  ;;  %1052 = vmatpush.msrb.mxu3 %v1019_v53 }
  0x4e   : > { %2601 = vrot.lane.b32.xlu0 %v2600_v19, %s2748_s14 }
  0x4f   : > { %1053 = vmatpush.msrb.mxu3 %v1018_v54 }
  0x5b   : > { %970 = vmatmul.bf16.gmra.mxu0 %v1992_v31 }
  0x5c   : > { %989 = vmatmul.bf16.gmra.mxu1 %v1996_v32  ;;  %v2605_v32 = vpack.i.bf16 %v1070_v26, %v1069_v25  ;;  %v2751_v25 = vmov 0  }
  0x5d   : > { %1008 = vmatmul.bf16.gmra.mxu2 %v2000_v33  ;;  %2610 = vset.pattern.permute.xlu0 %v2751_v25 }
  0x5e   : > { %2606 = vrot.lane.b32.xlu0 %v2605_v32, %s2748_s14  ;;  %2612 = vset.pattern.permute.xlu1 %v2751_v25 }
  0xa8   : > { %v890_v44 = vpop.f32.mrf.mxu0 }
  0xa9   : > { %v909_v45 = vpop.f32.mrf.mxu1  ;;  %v891_v59 = vadd.f32 %v2617_v56, %v890_v44 }
  0xab   : > { %v910_v62 = vadd.f32 %v909_v45, %v891_v59 }
  0xb0   : > { %v928_v50 = vpop.f32.mrf.mxu2  ;;  %v892_v51 = vpop.f32.mrf.mxu0 }
  0xb1   : > { %v911_v52 = vpop.f32.mrf.mxu1  ;;  %v947_v60 = vpop.f32.mrf.mxu3  ;;  %v929_v1 = vadd.f32 %v928_v50, %v910_v62  ;;  %v893_v2 = vadd.f32 %v2617_v56, %v892_v51 }
  0xb3   : > { %v948_v4 = vadd.f32 %v947_v60, %v929_v1  ;;  %v912_v7 = vadd.f32 %v911_v52, %v893_v2 }
  0xb8   : > { %v930_v55 = vpop.f32.mrf.mxu2  ;;  %v895_v57 = vpop.f32.mrf.mxu0 }
  0xb9   : > { %v914_v58 = vpop.f32.mrf.mxu1  ;;  %v949_v8 = vpop.f32.mrf.mxu3  ;;  %v931_v10 = vadd.f32 %v930_v55, %v912_v7  ;;  %v896_v13 = vadd.f32 %v2617_v56, %v895_v57  ;;  %v2618_v57 = vld [vmem:[%s3526_s4] ss:$0 sm:$0xff] }
  0xbb   : > { %v950_v20 = vadd.f32 %v949_v8, %v931_v10  ;;  %v915_v22 = vadd.f32 %v914_v58, %v896_v13 }
  0xc0   : > { %v933_v61 = vpop.f32.mrf.mxu2  ;;  %v897_v63 = vpop.f32.mrf.mxu0 }
  0xc1   : > { %v916_v0 = vpop.f32.mrf.mxu1  ;;  %v952_v30 = vpop.f32.mrf.mxu3  ;;  %v934_v31 = vadd.f32 %v933_v61, %v915_v22  ;;  %v898_v33 = vadd.f32 %v2617_v56, %v897_v63 }
  0xc2   : > { %v2602_v62 = vpop.permute.xlu0 %2601 }
  0xc3   : > { %v953_v36 = vadd.f32 %v952_v30, %v934_v31  ;;  %v917_v40 = vadd.f32 %v916_v0, %v898_v33  ;;  %v2603_v1 = vunpack.i.l.bf16 %v2602_v62 }
  0xc8   : > { %v935_v3 = vpop.f32.mrf.mxu2  ;;  %v966_v5 = vpop.f32.mrf.mxu0 }
  0xc9   : > { %v985_v6 = vpop.f32.mrf.mxu1  ;;  %v967_v9 = vadd.f32 %v966_v5, %v948_v4  ;;  %v936_v43 = vadd.f32 %v935_v3, %v917_v40  ;;  %v954_v44 = vpop.f32.mrf.mxu3  ;;  %v2425_v40 = vld [vmem:[%s3529_s7 + $0x1a4] sm:$0xf0] }
  0xcb   : > { %v986_v18 = vadd.f32 %v985_v6, %v967_v9  ;;  %v955_v47 = vadd.f32 %v954_v44, %v936_v43  ;;  %v2604_v9 = vunpack.i.h.bf16 %v2602_v62  ;;  %v2571_v43 = vld [vmem:[%s3529_s7 + $0x194] sm:$0xf]  ;;  %v2433_v44 = vld [vmem:[%s3529_s7 + $0x1ac] sm:$0xf0] }
  0xcc   : > { %v2559_v62 = vld [vmem:[%s3529_s7 + $0x130] sm:$0xf0] }
  0xd0   : > { %v1004_v21 = vpop.f32.mrf.mxu2  ;;  %v968_v24 = vpop.f32.mrf.mxu0 }
  0xd1   : > { %v1005_v23 = vadd.f32 %v1004_v21, %v986_v18  ;;  %v987_v27 = vpop.f32.mrf.mxu1  ;;  %v969_v29 = vadd.f32 %v968_v24, %v950_v20  ;;  %v2607_v13 = vpop.permute.xlu0 %2606  ;;  %v2750_v24 = vmov 1  }
  0xd2   : > { %v2608_v16 = vunpack.i.l.bf16 %v2607_v13  ;;  %v2609_v21 = vunpack.i.h.bf16 %v2607_v13  ;;  %2611 = vset.pattern.permute.xlu2 %v2750_v24 }
  0xd3   : > { %v1014_v28 = vmax.f32 %v1005_v23, 0.0  ;;  %v988_v34 = vadd.f32 %v987_v27, %v969_v29 }
  0xd5   : > { %1054 = vmatmul.f32.vlgmr.msrb.gmra.mxu3 %v1014_v28 }
  0xd8   : > { %v1006_v35 = vpop.f32.mrf.mxu2  ;;  %v971_v38 = vpop.f32.mrf.mxu0 }
  0xd9   : > { %v1007_v37 = vadd.f32 %v1006_v35, %v988_v34  ;;  %v990_v39 = vpop.f32.mrf.mxu1  ;;  %v972_v42 = vadd.f32 %v971_v38, %v953_v36  ;;  %v2431_v34 = vld [vmem:[%s3529_s7 + $0x190] sm:$0xf]  ;;  %v2574_v35 = vld [vmem:[%s3529_s7 + $0x1a8] sm:$0xf0]  ;;  %v2423_v36 = vld [vmem:[%s3529_s7 + $0x188] sm:$0xf] }
  0xda   : > { %v2573_v38 = vld [vmem:[%s3529_s7 + $0x1a0] sm:$0xf0] }
  0xdb   : > { %v1015_v41 = vmax.f32 %v1007_v37, 0.0  ;;  %v991_v45 = vadd.f32 %v990_v39, %v972_v42  ;;  %v2432_v37 = vor.u32 %v2574_v35, %v2431_v34  ;;  %v2570_v39 = vld [vmem:[%s3529_s7 + $0x18c] sm:$0xf]  ;;  %v2535_v35 = vld [vmem:[%s3529_s7 + $0x74] sm:$0xf] }
  0xdc   : > { %v2428_v42 = vor.u32 %v2570_v39, %v2425_v40  ;;  %v2538_v34 = vld [vmem:[%s3529_s7 + $0x88] sm:$0xf0]  ;;  %v2536_v39 = vld [vmem:[%s3529_s7 + $0x7c] sm:$0xf]  ;;  %v2293_v40 = vld [vmem:[%s3529_s7 + $0x94] sm:$0xf0] }
  0xdd   : > { %1057 = vmatmul.f32.gmra.mxu3 %v1015_v41  ;;  %v2424_v41 = vor.u32 %v2573_v38, %v2423_v36  ;;  %1594 = vmatpush.bf16.msra.mxu2 %v2432_v37  ;;  %v2285_v36 = vld [vmem:[%s3529_s7 + $0x8c] sm:$0xf0] }
  0xde   : > { %1575 = vmatpush.bf16.msra.mxu1 %v2428_v42  ;;  %v2288_v38 = vor.u32 %v2535_v35, %v2285_v36  ;;  %v2263_v42 = vld [vmem:[%s3529_s7 + $0x40] sm:$0xf] }
  0xdf   : > { %1556 = vmatpush.bf16.msra.mxu0 %v2424_v41  ;;  %v2296_v41 = vor.u32 %v2536_v39, %v2293_v40  ;;  %v1123_v36 = vld [vmem:[%s3527_s5] sm:$0x3] }
  0xe0   : > { %v1009_v46 = vpop.f32.mrf.mxu2  ;;  %v973_v49 = vpop.f32.mrf.mxu0 }
  0xe1   : > { %v1010_v48 = vadd.f32 %v1009_v46, %v991_v45  ;;  %v974_v51 = vadd.f32 %v973_v49, %v955_v47  ;;  %v992_v52 = vpop.f32.mrf.mxu1  ;;  %v2403_v45 = vld [vmem:[%s3529_s7 + $0x158] sm:$0xf]  ;;  %v2436_v46 = vor.u32 %v2571_v43, %v2433_v44  ;;  %v2567_v47 = vld [vmem:[%s3529_s7 + $0x170] sm:$0xf0]  ;;  %v2395_v49 = vld [vmem:[%s3529_s7 + $0x150] sm:$0xf] }
  0xe2   : > { %v2532_v43 = vld [vmem:[%s3529_s7 + $0x58] sm:$0xf0]  ;;  %v2255_v44 = vld [vmem:[%s3529_s7 + $0x38] sm:$0xf] }
  0xe3   : > { %v1016_v50 = vmax.f32 %v1010_v48, 0.0  ;;  %v993_v53 = vadd.f32 %v992_v52, %v974_v51  ;;  %v2404_v48 = vor.u32 %v2567_v47, %v2403_v45  ;;  %v2563_v51 = vld [vmem:[%s3529_s7 + $0x154] sm:$0xf]  ;;  %1613 = vmatpush.bf16.msra.mxu3 %v2436_v46  ;;  %v2264_v45 = vor.u32 %v2532_v43, %v2263_v42  ;;  %v2528_v47 = vld [vmem:[%s3529_s7 + $0x3c] sm:$0xf] }
  0xe4   : > { %v2531_v46 = vld [vmem:[%s3529_s7 + $0x50] sm:$0xf0]  ;;  %v3340_v42 = vperm.slane %v1123_v36, 1  ;;  %v3342_v43 = vperm.slane %v1123_v36, 0 }
  0xe5   : > { %1060 = vmatmul.f32.gmra.mxu3 %v1016_v50  ;;  %v2566_v50 = vld [vmem:[%s3529_s7 + $0x168] sm:$0xf0]  ;;  %1595 = vmatpush.bf16.msra.mxu2 %v2404_v48  ;;  %v2257_v48 = vld [vmem:[%s3529_s7 + $0x54] sm:$0xf0] }
  0xe6   : > { %v2396_v52 = vor.u32 %v2566_v50, %v2395_v49  ;;  %v2256_v49 = vor.u32 %v2531_v46, %v2255_v44  ;;  %v2260_v50 = vor.u32 %v2528_v47, %v2257_v48  ;;  %v2335_v44 = vld [vmem:[%s3529_s7 + $0xc0] sm:$0xf]  ;;  %v2327_v46 = vld [vmem:[%s3529_s7 + $0xb8] sm:$0xf] }
  0xe8   : > { %v1011_v54 = vpop.f32.mrf.mxu2  ;;  %1557 = vmatpush.bf16.msra.mxu0 %v2396_v52  ;;  %v2265_v52 = vld [vmem:[%s3529_s7 + $0x5c] sm:$0xf0] }
  0xe9   : > { %v1012_v55 = vadd.f32 %v1011_v54, %v993_v53  ;;  %v2397_v53 = vld [vmem:[%s3529_s7 + $0x16c] sm:$0xf0]  ;;  %v2564_v54 = vld [vmem:[%s3529_s7 + $0x15c] sm:$0xf] }
  0xeb   : > { %v1017_v56 = vmax.f32 %v1012_v55, 0.0  ;;  %v2405_v55 = vld [vmem:[%s3529_s7 + $0x174] sm:$0xf0] }
  0xed   : > { %1063 = vmatmul.f32.gmra.mxu3 %v1017_v56  ;;  %v2400_v56 = vor.u32 %v2563_v51, %v2397_v53  ;;  %v2529_v51 = vld [vmem:[%s3529_s7 + $0x44] sm:$0xf] }
  0xee   : > { %v2268_v53 = vor.u32 %v2529_v51, %v2265_v52  ;;  %v2329_v51 = vld [vmem:[%s3529_s7 + $0xd4] sm:$0xf0] }
  0xef   : > { %1576 = vmatpush.bf16.msra.mxu1 %v2400_v56  ;;  %v2227_v56 = vld [vmem:[%s3529_s7] sm:$0xf] }
 0x158   : > { %v1055_v58 = vpop.f32.mrf.mxu3 }
 0x159   : > { %v1056_v59 = vadd.f32 %v2618_v57, %v1055_v58  ;;  %v2375_v58 = vld [vmem:[%s3529_s7 + $0x120] sm:$0xf] }
 0x15b   : > { %v1071_v60 = vmul.f32 0.5, %v1056_v59 }
 0x15d   : > { %v1075_v61 = vmul.f32 1.442695, %v1071_v60  ;;  %v2367_v60 = vld [vmem:[%s3529_s7 + $0x118] sm:$0xf] }
 0x15f   : > { %2620 = vpow2.f32 %v1075_v61 }
 0x160   : > { %v1058_v63 = vpop.f32.mrf.mxu3 }
 0x161   : > { %v1059_v0 = vadd.f32 %v2618_v57, %v1058_v63  ;;  %v2556_v63 = vld [vmem:[%s3529_s7 + $0x11c] sm:$0xf] }
 0x163   : > { %v1072_v2 = vmul.f32 0.5, %v1059_v0 }
 0x165   : > { %v2621_v3 = vpop.eup %2620  ;;  %v1077_v4 = vmul.f32 1.442695, %v1072_v2 }
 0x166   : > { %v1099_v5 = vmul.f32 %v2621_v3, %v2603_v1  ;;  %v2368_v1 = vor.u32 %v2559_v62, %v2367_v60  ;;  %v2557_v3 = vld [vmem:[%s3529_s7 + $0x124] sm:$0xf]  ;;  %v2229_v60 = vld [vmem:[%s3529_s7 + $0x1c] sm:$0xf0] }
 0x167   : > { %2622 = vpow2.f32 %v1077_v4  ;;  %v2377_v4 = vld [vmem:[%s3529_s7 + $0x13c] sm:$0xf0] }
 0x168   : > { %v1061_v6 = vpop.f32.mrf.mxu3  ;;  %1107 = vrot.lane.b32.xlu1 %v1099_v5, %s2749_s17  ;;  %v2380_v5 = vor.u32 %v2557_v3, %v2377_v4  ;;  %1558 = vmatpush.bf16.msra.mxu0 %v2368_v1  ;;  %v2576_v3 = vld [vmem:[%s3529_s7 + $0x1b8] sm:$0xf0]  ;;  %v2439_v4 = vld [vmem:[%s3529_s7 + $0x198] sm:$0xf] }
 0x169   : > { %v1062_v7 = vadd.f32 %v2618_v57, %v1061_v6  ;;  %v2347_v6 = vld [vmem:[%s3529_s7 + $0xe8] sm:$0xf] }
 0x16b   : > { %v1073_v8 = vmul.f32 0.5, %v1062_v7 }
 0x16d   : > { %v2623_v10 = vpop.eup %2622  ;;  %v1079_v11 = vmul.f32 1.442695, %v1073_v8  ;;  %v2339_v8 = vld [vmem:[%s3529_s7 + $0xe0] sm:$0xf] }
 0x16e   : > { %v1100_v12 = vmul.f32 %v2623_v10, %v2604_v9  ;;  %v2552_v10 = vld [vmem:[%s3529_s7 + $0xf8] sm:$0xf0] }
 0x16f   : > { %2624 = vpow2.f32 %v1079_v11  ;;  %v2549_v11 = vld [vmem:[%s3529_s7 + $0xe4] sm:$0xf]  ;;  %v2340_v13 = vor.u32 %v2552_v10, %v2339_v8  ;;  %v2441_v8 = vld [vmem:[%s3529_s7 + $0x1b4] sm:$0xf0] }
 0x170   : > { %v1064_v14 = vpop.f32.mrf.mxu3  ;;  %1109 = vrot.lane.b32.xlu1 %v1100_v12, %s2749_s17  ;;  %v2341_v12 = vld [vmem:[%s3529_s7 + $0xfc] sm:$0xf0] }
 0x171   : > { %v1065_v15 = vadd.f32 %v2618_v57, %v1064_v14  ;;  %v2408_v57 = vor.u32 %v2564_v54, %v2405_v55  ;;  %v2344_v14 = vor.u32 %v2549_v11, %v2341_v12  ;;  %1559 = vmatpush.bf16.msra.mxu0 %v2340_v13  ;;  %v2235_v54 = vld [vmem:[%s3529_s7 + $0x8] sm:$0xf]  ;;  %v2525_v55 = vld [vmem:[%s3529_s7 + $0x20] sm:$0xf0]  ;;  %v2411_v13 = vld [vmem:[%s3529_s7 + $0x160] sm:$0xf] }
 0x172   : > { %v2419_v11 = vld [vmem:[%s3529_s7 + $0x168] sm:$0xf]  ;;  %v2569_v12 = vld [vmem:[%s3529_s7 + $0x180] sm:$0xf0] }
 0x173   : > { %v1074_v17 = vmul.f32 0.5, %v1065_v15  ;;  %1614 = vmatpush.bf16.msra.mxu3 %v2408_v57  ;;  %v2236_v57 = vor.u32 %v2525_v55, %v2235_v54  ;;  %v2307_v54 = vld [vmem:[%s3529_s7 + $0x88] sm:$0xf]  ;;  %v2541_v55 = vld [vmem:[%s3529_s7 + $0xa0] sm:$0xf0] }
 0x175   : > { %v2625_v18 = vpop.eup %2624  ;;  %v1081_v19 = vmul.f32 1.442695, %v1074_v17 }
 0x176   : > { %v1101_v20 = vmul.f32 %v2625_v18, %v2608_v16  ;;  %v2349_v16 = vld [vmem:[%s3529_s7 + $0x104] sm:$0xf0]  ;;  %v2319_v18 = vld [vmem:[%s3529_s7 + $0xb0] sm:$0xf] }
 0x177   : > { %2626 = vpow2.f32 %v1081_v19  ;;  %1615 = vmatpush.bf16.msra.mxu3 %v2380_v5  ;;  %v2546_v19 = vld [vmem:[%s3529_s7 + $0xc8] sm:$0xf0] }
 0x178   : > { %1111 = vrot.lane.b32.xlu2 %v1101_v20, %s2749_s17  ;;  %v2311_v20 = vld [vmem:[%s3529_s7 + $0xa8] sm:$0xf] }
 0x17d   : > { %v2627_v22 = vpop.eup %2626 }
 0x17e   : > { %v1102_v23 = vmul.f32 %v2627_v22, %v2609_v21  ;;  %v2320_v21 = vor.u32 %v2546_v19, %v2319_v18  ;;  %v2545_v22 = vld [vmem:[%s3529_s7 + $0xc0] sm:$0xf0] }
 0x180   : > { %1113 = vrot.lane.b32.xlu2 %v1102_v23, %s2749_s17  ;;  %v2542_v23 = vld [vmem:[%s3529_s7 + $0xac] sm:$0xf] }
 0x1d2   : > { %v1112_v26 = vpop.permute.xlu2 %1111 }
 0x1d3   : > { %v1121_v33 = vadd.f32 %v1112_v26, %v1062_v7 }
 0x1da   : > { %v1108_v27 = vpop.permute.xlu1 %1107  ;;  %v1114_v29 = vpop.permute.xlu2 %1113 }
 0x1db   : > { %v1119_v28 = vadd.f32 %v1108_v27, %v1056_v59  ;;  %v1122_v31 = vadd.f32 %v1114_v29, %v1065_v15  ;;  %v2543_v27 = vld [vmem:[%s3529_s7 + $0xb4] sm:$0xf] }
 0x1dd   : > { %1150 = vperm.xlu2 %2611, %v1119_v28   ;;  %1126 = vperm.xlu0 %2610, %v1119_v28   ;;  %v2321_v28 = vld [vmem:[%s3529_s7 + $0xcc] sm:$0xf0] }
 0x1de   : > { %v2324_v29 = vor.u32 %v2543_v27, %v2321_v28 }
 0x1e2   : > { %v1110_v30 = vpop.permute.xlu1 %1109 }
 0x1e3   : > { %v1120_v32 = vadd.f32 %v1110_v30, %v1059_v0  ;;  %v2291_v30 = vld [vmem:[%s3529_s7 + $0x78] sm:$0xf] }
 0x1e5   : > { %2614 = vset.pattern.permute.xlu2 %v2751_v25  ;;  %1141 = vperm.xlu0 %2610, %v1122_v31   ;;  %v2312_v25 = vor.u32 %v2545_v22, %v2311_v20  ;;  %v2391_v20 = vld [vmem:[%s3529_s7 + $0x130] sm:$0xf]  ;;  %v2383_v22 = vld [vmem:[%s3529_s7 + $0x128] sm:$0xf] }
 0x1e6   : > { %1131 = vperm.xlu1 %2612, %v1120_v32   ;;  %1136 = vperm.xlu2 %2614, %v1121_v33  }
 0x1e7   : > { %1560 = vmatpush.bf16.msra.mxu0 %v2312_v25  ;;  %v2558_v25 = vld [vmem:[%s3529_s7 + $0x12c] sm:$0xf] }
 0x1ed   : > { %1861 = vrot.lane.b32.xlu0 %v1056_v59, %s2752_s18  ;;  %v2560_v59 = vld [vmem:[%s3529_s7 + $0x138] sm:$0xf0] }
 0x1ee   : > { %2613 = vset.pattern.permute.xlu1 %v2750_v24  ;;  %2615 = vset.pattern.permute.xlu2 %v2750_v24  ;;  %v2376_v61 = vor.u32 %v2560_v59, %v2375_v58  ;;  %v2524_v58 = vld [vmem:[%s3529_s7 + $0x18] sm:$0xf0]  ;;  %v2521_v59 = vld [vmem:[%s3529_s7 + $0x4] sm:$0xf] }
 0x1ef   : > { %1154 = vperm.xlu1 %2613, %v1120_v32   ;;  %1162 = vperm.xlu2 %2615, %v1122_v31   ;;  %v2539_v31 = vld [vmem:[%s3529_s7 + $0x90] sm:$0xf0]  ;;  %v2283_v32 = vld [vmem:[%s3529_s7 + $0x70] sm:$0xf]  ;;  %v2232_v62 = vor.u32 %v2521_v59, %v2229_v60  ;;  %v2540_v59 = vld [vmem:[%s3529_s7 + $0x98] sm:$0xf0] }
 0x1f0   : > { %2616 = vset.pattern.permute.xlu0 %v2750_v24  ;;  %1596 = vmatpush.bf16.msra.mxu2 %v2376_v61  ;;  %v2313_v24 = vld [vmem:[%s3529_s7 + $0xc4] sm:$0xf0]  ;;  %v2284_v37 = vor.u32 %v2538_v34, %v2283_v32  ;;  %v2228_v61 = vor.u32 %v2524_v58, %v2227_v56  ;;  %v2554_v32 = vld [vmem:[%s3529_s7 + $0x108] sm:$0xf0]  ;;  %v2357_v34 = vld [vmem:[%s3529_s7 + $0x10c] sm:$0xf0]  ;;  %v2308_v58 = vor.u32 %v2541_v55, %v2307_v54 }
 0x1f1   : > { %v2316_v26 = vor.u32 %v2542_v23, %v2313_v24  ;;  %v2561_v24 = vld [vmem:[%s3529_s7 + $0x140] sm:$0xf0]  ;;  %v2299_v56 = vld [vmem:[%s3529_s7 + $0x80] sm:$0xf] }
 0x1f2   : > { %1561 = vmatpush.bf16.msra.mxu0 %v2284_v37  ;;  %v2384_v27 = vor.u32 %v2561_v24, %v2383_v22  ;;  %v2537_v60 = vld [vmem:[%s3529_s7 + $0x84] sm:$0xf]  ;;  %v2523_v24 = vld [vmem:[%s3529_s7 + $0x14] sm:$0xf] }
 0x1f5   : > { %1867 = vrot.lane.b32.xlu0 %v1065_v15, %s2752_s18  ;;  %v2550_v15 = vld [vmem:[%s3529_s7 + $0xec] sm:$0xf] }
 0x1f6   : > { %v2352_v17 = vor.u32 %v2550_v15, %v2349_v16  ;;  %1562 = vmatpush.bf16.msra.mxu0 %v2256_v49  ;;  %v2568_v15 = vld [vmem:[%s3529_s7 + $0x178] sm:$0xf0]  ;;  %v2565_v16 = vld [vmem:[%s3529_s7 + $0x164] sm:$0xf]  ;;  %v2547_v49 = vld [vmem:[%s3529_s7 + $0xd0] sm:$0xf0] }
 0x1f7   : > { %1158 = vperm.xlu1 %2613, %v1121_v33   ;;  %1865 = vrot.lane.b32.xlu2 %v1062_v7, %s2752_s18  ;;  %v2553_v7 = vld [vmem:[%s3529_s7 + $0x100] sm:$0xf0]  ;;  %v2292_v33 = vor.u32 %v2539_v31, %v2291_v30  ;;  %v2412_v18 = vor.u32 %v2568_v15, %v2411_v13  ;;  %v2555_v30 = vld [vmem:[%s3529_s7 + $0x110] sm:$0xf0]  ;;  %v2355_v31 = vld [vmem:[%s3529_s7 + $0xf0] sm:$0xf]  ;;  %v2328_v52 = vor.u32 %v2547_v49, %v2327_v46 }
 0x1f8   : > { %v2348_v9 = vor.u32 %v2553_v7, %v2347_v6  ;;  %1616 = vmatpush.bf16.msra.mxu3 %v2352_v17  ;;  %v2575_v6 = vld [vmem:[%s3529_s7 + $0x1b0] sm:$0xf0]  ;;  %v2572_v7 = vld [vmem:[%s3529_s7 + $0x19c] sm:$0xf]  ;;  %v2413_v17 = vld [vmem:[%s3529_s7 + $0x17c] sm:$0xf0] }
 0x1f9   : > { %v2444_v10 = vor.u32 %v2572_v7, %v2441_v8  ;;  %v2416_v19 = vor.u32 %v2565_v16, %v2413_v17  ;;  %v2530_v8 = vld [vmem:[%s3529_s7 + $0x4c] sm:$0xf]  ;;  %v2527_v15 = vld [vmem:[%s3529_s7 + $0x30] sm:$0xf0] }
 0x1fa   : > { %1597 = vmatpush.bf16.msra.mxu2 %v2348_v9  ;;  %1563 = vmatpush.bf16.msra.mxu0 %v2228_v61  ;;  %v2440_v9 = vor.u32 %v2575_v6, %v2439_v4  ;;  %v2300_v61 = vor.u32 %v2540_v59, %v2299_v56  ;;  %v2271_v4 = vld [vmem:[%s3529_s7 + $0x48] sm:$0xf] }
 0x1fc   : > { %1617 = vmatpush.bf16.msra.mxu3 %v2324_v29  ;;  %v2363_v29 = vld [vmem:[%s3529_s7 + $0xf8] sm:$0xf] }
 0x1fd   : > { %v2364_v35 = vor.u32 %v2555_v30, %v2363_v29 }
 0x1fe   : > { %1598 = vmatpush.bf16.msra.mxu2 %v2320_v21  ;;  %1632 = vmatpush.bf16.msrb.mxu0 %v2440_v9  ;;  %v2562_v21 = vld [vmem:[%s3529_s7 + $0x148] sm:$0xf0] }
 0x1ff   : > { %1863 = vrot.lane.b32.xlu1 %v1059_v0, %s2752_s18  ;;  %v2369_v0 = vld [vmem:[%s3529_s7 + $0x134] sm:$0xf0]  ;;  %v2392_v23 = vor.u32 %v2562_v21, %v2391_v20  ;;  %v2526_v20 = vld [vmem:[%s3529_s7 + $0x28] sm:$0xf0] }
 0x200   : > { %v2372_v2 = vor.u32 %v2556_v63, %v2369_v0  ;;  %1618 = vmatpush.bf16.msra.mxu3 %v2296_v41  ;;  %v2522_v63 = vld [vmem:[%s3529_s7 + $0xc] sm:$0xf]  ;;  %v2237_v0 = vld [vmem:[%s3529_s7 + $0x24] sm:$0xf0] }
 0x201   : > { %v2240_v1 = vor.u32 %v2522_v63, %v2237_v0  ;;  %v2279_v63 = vld [vmem:[%s3529_s7 + $0x50] sm:$0xf]  ;;  %v2534_v0 = vld [vmem:[%s3529_s7 + $0x68] sm:$0xf0] }
 0x202   : > { %1577 = vmatpush.bf16.msra.mxu1 %v2372_v2  ;;  %1599 = vmatpush.bf16.msra.mxu2 %v2292_v33  ;;  %v2447_v2 = vld [vmem:[%s3529_s7 + $0x1a0] sm:$0xf]  ;;  %v2551_v33 = vld [vmem:[%s3529_s7 + $0xf4] sm:$0xf] }
 0x203   : > { %v2448_v5 = vor.u32 %v2576_v3, %v2447_v2  ;;  %1633 = vmatpush.bf16.msrb.mxu0 %v2412_v18  ;;  %v2360_v40 = vor.u32 %v2551_v33, %v2357_v34 }
 0x204   : > { %1619 = vmatpush.bf16.msra.mxu3 %v2268_v53 }
 0x206   : > { %1578 = vmatpush.bf16.msra.mxu1 %v2344_v14  ;;  %1600 = vmatpush.bf16.msra.mxu2 %v2264_v45  ;;  %v2420_v14 = vor.u32 %v2569_v12, %v2419_v11  ;;  %v2548_v45 = vld [vmem:[%s3529_s7 + $0xd8] sm:$0xf0]  ;;  %v2280_v12 = vor.u32 %v2534_v0, %v2279_v63 }
 0x207   : > { %1634 = vmatpush.bf16.msrb.mxu0 %v2384_v27  ;;  %v2336_v48 = vor.u32 %v2548_v45, %v2335_v44 }
 0x208   : > { %1620 = vmatpush.bf16.msra.mxu3 %v2240_v1  ;;  %v2619_v1 = vld [vmem:[%s3528_s6] ss:$0 sm:$0xff] }
 0x20a   : > { %1579 = vmatpush.bf16.msra.mxu1 %v2316_v26  ;;  %1601 = vmatpush.bf16.msra.mxu2 %v2236_v57  ;;  %v2385_v26 = vld [vmem:[%s3529_s7 + $0x144] sm:$0xf0] }
 0x20b   : > { %v2388_v28 = vor.u32 %v2558_v25, %v2385_v26  ;;  %v2245_v25 = vld [vmem:[%s3529_s7 + $0x2c] sm:$0xf0] }
 0x20c   : > { %2577 = vmatpush.bf16.msrb.mxu3 %v2440_v9  ;;  %v2273_v9 = vld [vmem:[%s3529_s7 + $0x64] sm:$0xf0] }
 0x20e   : > { %1580 = vmatpush.bf16.msra.mxu1 %v2288_v38  ;;  %1670 = vmatpush.bf16.msrb.mxu2 %v2448_v5  ;;  %v2356_v38 = vor.u32 %v2554_v32, %v2355_v31  ;;  %v2533_v5 = vld [vmem:[%s3529_s7 + $0x60] sm:$0xf0]  ;;  %v2248_v32 = vor.u32 %v2523_v24, %v2245_v25 }
 0x20f   : > { %v2272_v13 = vor.u32 %v2533_v5, %v2271_v4 }
 0x210   : > { %2578 = vmatpush.bf16.msrb.mxu3 %v2412_v18  ;;  %1635 = vmatpush.bf16.msrb.mxu0 %v2356_v38  ;;  %v2276_v18 = vor.u32 %v2530_v8, %v2273_v9 }
 0x212   : > { %1581 = vmatpush.bf16.msra.mxu1 %v2260_v50  ;;  %1671 = vmatpush.bf16.msrb.mxu2 %v2420_v14  ;;  %v2544_v50 = vld [vmem:[%s3529_s7 + $0xbc] sm:$0xf]  ;;  %v2251_v14 = vld [vmem:[%s3529_s7 + $0x18] sm:$0xf] }
 0x213   : > { %v2332_v53 = vor.u32 %v2544_v50, %v2329_v51  ;;  %v2252_v22 = vor.u32 %v2527_v15, %v2251_v14 }
 0x214   : > { %2579 = vmatpush.bf16.msrb.mxu3 %v2384_v27  ;;  %1636 = vmatpush.bf16.msrb.mxu0 %v2328_v52 }
 0x216   : > { %1582 = vmatpush.bf16.msra.mxu1 %v2232_v62  ;;  %1672 = vmatpush.bf16.msrb.mxu2 %v2392_v23  ;;  %v2301_v62 = vld [vmem:[%s3529_s7 + $0x9c] sm:$0xf0] }
 0x217   : > { %v2304_v3 = vor.u32 %v2537_v60, %v2301_v62 }
 0x218   : > { %2580 = vmatpush.bf16.msrb.mxu3 %v2356_v38  ;;  %1637 = vmatpush.bf16.msrb.mxu0 %v2300_v61 }
 0x21a   : > { %1651 = vmatpush.bf16.msrb.mxu1 %v2444_v10  ;;  %1673 = vmatpush.bf16.msrb.mxu2 %v2364_v35 }
 0x21c   : > { %2581 = vmatpush.bf16.msrb.mxu3 %v2328_v52  ;;  %1638 = vmatpush.bf16.msrb.mxu0 %v2272_v13 }
 0x21e   : > { %1652 = vmatpush.bf16.msrb.mxu1 %v2416_v19  ;;  %1674 = vmatpush.bf16.msrb.mxu2 %v2336_v48  ;;  %v2243_v19 = vld [vmem:[%s3529_s7 + $0x10] sm:$0xf] }
 0x21f   : > { %v2244_v23 = vor.u32 %v2526_v20, %v2243_v19 }
 0x220   : > { %2582 = vmatpush.bf16.msrb.mxu3 %v2300_v61 }
 0x221   : > { %1639 = vmatpush.bf16.msrb.mxu0 %v2244_v23 }
 0x222   : > { %1653 = vmatpush.bf16.msrb.mxu1 %v2388_v28  ;;  %1675 = vmatpush.bf16.msrb.mxu2 %v2308_v58 }
 0x224   : > { %2583 = vmatpush.bf16.msrb.mxu3 %v2272_v13 }
 0x226   : > { %1654 = vmatpush.bf16.msrb.mxu1 %v2360_v40  ;;  %1676 = vmatpush.bf16.msrb.mxu2 %v2280_v12 }
 0x228   : > { %2584 = vmatpush.bf16.msrb.mxu3 %v2244_v23 }
 0x22a   : > { %1655 = vmatpush.bf16.msrb.mxu1 %v2332_v53  ;;  %1677 = vmatpush.bf16.msrb.mxu2 %v2252_v22 }
 0x22e   : > { %1656 = vmatpush.bf16.msrb.mxu1 %v2304_v3 }
 0x232   : > { %1657 = vmatpush.bf16.msrb.mxu1 %v2276_v18 }
 0x236   : > { %1658 = vmatpush.bf16.msrb.mxu1 %v2248_v32 }
 0x237   : > { %v1151_v37 = vpop.permute.xlu2 %1150 }
 0x238   : > { %v1166_v57 = vmul.f32 %v3340_v42, %v1151_v37 }
 0x240   : > { %v1137_v6 = vpop.permute.xlu2 %1136 }
 0x241   : > { %v1147_v34 = vmul.f32 %v3342_v43, %v1137_v6 }
 0x249   : > { %v1163_v33 = vpop.permute.xlu2 %1162 }
 0x24a   : > { %v1169_v36 = vmul.f32 %v3340_v42, %v1163_v33 }
 0x24f   : > { %v1127_v41 = vpop.permute.xlu0 %1126 }
 0x250   : > { %v1145_v47 = vmul.f32 %v3342_v43, %v1127_v41 }
 0x252   : > { %v1170_v2 = vadd.f32 %v1166_v57, %v1145_v47 }
 0x254   : > { %v1178_v16 = vadd.f32 %v2619_v1, %v1170_v2 }
 0x256   : > { %v1182_v26 = vmax.f32 %v1178_v16, 0.0 }
 0x257   : > { %v1142_v28 = vpop.permute.xlu0 %1141 }
 0x258   : > { %v1132_v39 = vpop.permute.xlu1 %1131  ;;  %v1148_v35 = vmul.f32 %v3342_v43, %v1142_v28 }
 0x259   : > { %v1146_v10 = vmul.f32 %v3342_v43, %v1132_v39 }
 0x25a   : > { %v1173_v38 = vadd.f32 %v1169_v36, %v1148_v35 }
 0x25c   : > { %v1181_v40 = vadd.f32 %v2619_v1, %v1173_v38 }
 0x25e   : > { %v1185_v44 = vmax.f32 %v1181_v40, 0.0 }
 0x261   : > { %v1155_v7 = vpop.permute.xlu1 %1154 }
 0x262   : > { %v1167_v11 = vmul.f32 %v3340_v42, %v1155_v7 }
 0x264   : > { %v1171_v17 = vadd.f32 %v1167_v11, %v1146_v10 }
 0x266   : > { %v1179_v21 = vadd.f32 %v2619_v1, %v1171_v17 }
 0x268   : > { %v1183_v27 = vmax.f32 %v1179_v21, 0.0 }
 0x269   : > { %v1159_v29 = vpop.permute.xlu1 %1158 }
 0x26a   : > { %v1186_v30 = vpack.c.bf16 %v1183_v27, %v1182_v26  ;;  %v1168_v31 = vmul.f32 %v3340_v42, %v1159_v29  ;;  %v3430_v42 = vld [vmem:[%s3530_s8] sm:$0xff] }
 0x26b   : > { %v3433_v43 = vperm.slane %v3430_v42, 0  ;;  %v3436_v46 = vperm.slane %v3430_v42, 1  ;;  %v3441_v53 = vperm.slane %v3430_v42, 2  ;;  %v3444_v54 = vperm.slane %v3430_v42, 3 }
 0x26c   : > { %1564 = vmatmul.bf16.vlgmr.msra.gmra.mxu0 %v1186_v30  ;;  %1583 = vmatmul.bf16.vlgmr.msra.gmra.mxu1 %v1186_v30  ;;  %v1172_v37 = vadd.f32 %v1168_v31, %v1147_v34 }
 0x26d   : > { %1602 = vmatmul.bf16.vlgmr.msra.gmra.mxu2 %v1186_v30  ;;  %1621 = vmatmul.bf16.vlgmr.msra.gmra.mxu3 %v1186_v30 }
 0x26e   : > { %v1180_v39 = vadd.f32 %v2619_v1, %v1172_v37 }
 0x270   : > { %v1184_v41 = vmax.f32 %v1180_v39, 0.0 }
 0x272   : > { %v1187_v45 = vpack.c.bf16 %v1185_v44, %v1184_v41 }
 0x27c   : > { %1569 = vmatmul.bf16.gmra.mxu0 %v1187_v45  ;;  %1588 = vmatmul.bf16.gmra.mxu1 %v1187_v45 }
 0x27d   : > { %1607 = vmatmul.bf16.gmra.mxu2 %v1187_v45  ;;  %1626 = vmatmul.bf16.gmra.mxu3 %v1187_v45 }
 0x28c   : > { %1640 = vmatmul.bf16.vlgmr.msrb.gmra.mxu0 %v1186_v30  ;;  %1659 = vmatmul.bf16.vlgmr.msrb.gmra.mxu1 %v1186_v30 }
 0x28d   : > { %1645 = vmatmul.bf16.vlgmr.msrb.gmra.mxu3 %v1187_v45  ;;  %1678 = vmatmul.bf16.vlgmr.msrb.gmra.mxu2 %v1186_v30 }
 0x29c   : > { %1664 = vmatmul.bf16.gmra.mxu1 %v1187_v45 }
 0x29d   : > { %1683 = vmatmul.bf16.gmra.mxu2 %v1187_v45 }
 0x2e9   : > { %v1565_v47 = vpop.f32.mrf.mxu0  ;;  %v1584_v48 = vpop.f32.mrf.mxu1 }
 0x2ea   : > { %v1566_v49 = vadd.f32 %v1565_v47, %v3433_v43  ;;  %v1585_v50 = vadd.f32 %v1584_v48, %v3436_v46 }
 0x2ec   : > { %v1689_v51 = vsub.f32 0.0, %v1566_v49  ;;  %v1690_v52 = vsub.f32 0.0, %v1585_v50 }
 0x2ee   : > { %v1717_v55 = vmul.f32 1.442695, %v1689_v51  ;;  %v1719_v56 = vmul.f32 1.442695, %v1690_v52 }
 0x2f0   : > { %2628 = vpow2.f32 %v1717_v55  ;;  %v1603_v57 = vpop.f32.mrf.mxu2  ;;  %v1622_v58 = vpop.f32.mrf.mxu3 }
 0x2f1   : > { %2630 = vpow2.f32 %v1719_v56  ;;  %v1604_v59 = vadd.f32 %v1603_v57, %v3441_v53  ;;  %v1623_v60 = vadd.f32 %v1622_v58, %v3444_v54  ;;  %v1567_v61 = vpop.f32.mrf.mxu0  ;;  %v1586_v62 = vpop.f32.mrf.mxu1 }
 0x2f2   : > { %v1568_v63 = vadd.f32 %v1567_v61, %v3433_v43  ;;  %v1587_v0 = vadd.f32 %v1586_v62, %v3436_v46  ;;  %v3471_v62 = vperm.slane %v3430_v42, 5 }
 0x2f3   : > { %v1691_v1 = vsub.f32 0.0, %v1604_v59  ;;  %v1692_v2 = vsub.f32 0.0, %v1623_v60 }
 0x2f4   : > { %v1696_v3 = vsub.f32 0.0, %v1568_v63  ;;  %v1697_v4 = vsub.f32 0.0, %v1587_v0 }
 0x2f5   : > { %v1721_v5 = vmul.f32 1.442695, %v1691_v1  ;;  %v1723_v6 = vmul.f32 1.442695, %v1692_v2 }
 0x2f6   : > { %v2629_v7 = vpop.eup %2628  ;;  %v1731_v10 = vmul.f32 1.442695, %v1696_v3  ;;  %v1733_v12 = vmul.f32 1.442695, %v1697_v4 }
 0x2f7   : > { %v2631_v8 = vpop.eup %2630  ;;  %v1773_v9 = vadd.f32 1.0, %v2629_v7  ;;  %2632 = vpow2.f32 %v1721_v5 }
 0x2f8   : > { %v1774_v11 = vadd.f32 1.0, %v2631_v8  ;;  %2634 = vpow2.f32 %v1723_v6  ;;  %v1605_v13 = vpop.f32.mrf.mxu2  ;;  %v1624_v14 = vpop.f32.mrf.mxu3 }
 0x2f9   : > { %2636 = vrcp.f32 %v1773_v9  ;;  %v1606_v15 = vadd.f32 %v1605_v13, %v3441_v53  ;;  %v1625_v16 = vadd.f32 %v1624_v14, %v3444_v54  ;;  %v1570_v17 = vpop.f32.mrf.mxu0  ;;  %v1589_v18 = vpop.f32.mrf.mxu1 }
 0x2fa   : > { %2638 = vrcp.f32 %v1774_v11  ;;  %v1571_v19 = vadd.f32 %v1570_v17, %v3433_v43  ;;  %v1590_v20 = vadd.f32 %v1589_v18, %v3436_v46 }
 0x2fb   : > { %2640 = vpow2.f32 %v1731_v10  ;;  %v1698_v21 = vsub.f32 0.0, %v1606_v15  ;;  %v1699_v22 = vsub.f32 0.0, %v1625_v16 }
 0x2fc   : > { %2642 = vpow2.f32 %v1733_v12  ;;  %v1703_v23 = vsub.f32 0.0, %v1571_v19  ;;  %v1704_v26 = vsub.f32 0.0, %v1590_v20  ;;  %v3481_v19 = vperm.slane %v3430_v42, 6 }
 0x2fd   : > { %v2633_v24 = vpop.eup %2632  ;;  %v1735_v25 = vmul.f32 1.442695, %v1698_v21  ;;  %v1737_v29 = vmul.f32 1.442695, %v1699_v22 }
 0x2fe   : > { %v2635_v27 = vpop.eup %2634  ;;  %v1775_v28 = vadd.f32 1.0, %v2633_v24  ;;  %v1745_v32 = vmul.f32 1.442695, %v1703_v23  ;;  %v1747_v37 = vmul.f32 1.442695, %v1704_v26 }
 0x2ff   : > { %v2637_v30 = vpop.eup %2636  ;;  %v1776_v31 = vadd.f32 1.0, %v2635_v27  ;;  %2644 = vpow2.f32 %v1735_v25 }
 0x300   : > { %v2639_v33 = vpop.eup %2638  ;;  %1829 = vst [vmem:[%s3458_s23] sm:$0xff] %v2637_v30  ;;  %2646 = vrcp.f32 %v1775_v28  ;;  %v1608_v34 = vpop.f32.mrf.mxu2 }
 0x301   : > { %v1627_v35 = vpop.f32.mrf.mxu3  ;;  %v2641_v36 = vpop.eup %2640  ;;  %1830 = vst [vmem:[%s3458_s23 + $0x8] sm:$0xff] %v2639_v33  ;;  %2648 = vrcp.f32 %v1776_v31  ;;  %v1609_v38 = vadd.f32 %v1608_v34, %v3441_v53 }
 0x302   : > { %v1628_v39 = vadd.f32 %v1627_v35, %v3444_v54  ;;  %v1572_v40 = vpop.f32.mrf.mxu0  ;;  %v1591_v41 = vpop.f32.mrf.mxu1  ;;  %v1780_v45 = vadd.f32 1.0, %v2641_v36  ;;  %2650 = vpow2.f32 %v1737_v29 }
 0x303   : > { %v2643_v44 = vpop.eup %2642  ;;  %v1573_v47 = vadd.f32 %v1572_v40, %v3433_v43  ;;  %v1592_v48 = vadd.f32 %v1591_v41, %v3436_v46  ;;  %2652 = vpow2.f32 %v1745_v32  ;;  %v1705_v50 = vsub.f32 0.0, %v1609_v38 }
 0x304   : > { %v1781_v49 = vadd.f32 1.0, %v2643_v44  ;;  %v1706_v51 = vsub.f32 0.0, %v1628_v39  ;;  %2654 = vrcp.f32 %v1780_v45  ;;  %v3467_v43 = vperm.slane %v3430_v42, 4 }
 0x305   : > { %v1710_v52 = vsub.f32 0.0, %v1573_v47  ;;  %v1711_v55 = vsub.f32 0.0, %v1592_v48  ;;  %v2645_v56 = vpop.eup %2644  ;;  %v1749_v57 = vmul.f32 1.442695, %v1705_v50 }
 0x306   : > { %2656 = vrcp.f32 %v1781_v49  ;;  %v1751_v58 = vmul.f32 1.442695, %v1706_v51  ;;  %v2647_v59 = vpop.eup %2646  ;;  %v1782_v60 = vadd.f32 1.0, %v2645_v56 }
 0x307   : > { %2658 = vpow2.f32 %v1747_v37  ;;  %v1759_v61 = vmul.f32 1.442695, %v1710_v52  ;;  %v2649_v46 = vpop.eup %2648  ;;  %1831 = vst [vmem:[%s3458_s23 + $0x10] sm:$0xff] %v2647_v59  ;;  %v1761_v0 = vmul.f32 1.442695, %v1711_v55 }
 0x308   : > { %2660 = vpow2.f32 %v1749_v57  ;;  %v2651_v63 = vpop.eup %2650  ;;  %1832 = vst [vmem:[%s3458_s23 + $0x18] sm:$0xff] %v2649_v46  ;;  %v1610_v1 = vpop.f32.mrf.mxu2 }
 0x309   : > { %2662 = vrcp.f32 %v1782_v60  ;;  %v1629_v2 = vpop.f32.mrf.mxu3  ;;  %v2653_v3 = vpop.eup %2652  ;;  %v1783_v4 = vadd.f32 1.0, %v2651_v63  ;;  %v1611_v5 = vadd.f32 %v1610_v1, %v3441_v53 }
 0x30a   : > { %2664 = vpow2.f32 %v1751_v58  ;;  %v1630_v6 = vadd.f32 %v1629_v2, %v3444_v54  ;;  %v1641_v7 = vpop.f32.mrf.mxu0  ;;  %v1660_v8 = vpop.f32.mrf.mxu1  ;;  %v1787_v10 = vadd.f32 1.0, %v2653_v3 }
 0x30b   : > { %v2655_v9 = vpop.eup %2654  ;;  %2666 = vpow2.f32 %v1759_v61  ;;  %v1642_v11 = vadd.f32 %v1641_v7, %v3467_v43  ;;  %v1712_v13 = vsub.f32 0.0, %v1611_v5  ;;  %v1661_v14 = vadd.f32 %v1660_v8, %v3471_v62 }
 0x30c   : > { %v2657_v12 = vpop.eup %2656  ;;  %1836 = vst [vmem:[%s3458_s23 + $0x38] sm:$0xff] %v2655_v9  ;;  %2668 = vrcp.f32 %v1783_v4  ;;  %v1713_v53 = vsub.f32 0.0, %v1630_v6 }
 0x30d   : > { %v2659_v15 = vpop.eup %2658  ;;  %1837 = vst [vmem:[%s3458_s23 + $0x40] sm:$0xff] %v2657_v12  ;;  %2670 = vrcp.f32 %v1787_v10  ;;  %v1693_v16 = vsub.f32 0.0, %v1642_v11  ;;  %v1763_v18 = vmul.f32 1.442695, %v1712_v13  ;;  %v1694_v23 = vsub.f32 0.0, %v1661_v14 }
 0x30e   : > { %v2661_v54 = vpop.eup %2660  ;;  %v1788_v17 = vadd.f32 1.0, %v2659_v15  ;;  %2672 = vpow2.f32 %v1761_v0  ;;  %v1765_v26 = vmul.f32 1.442695, %v1713_v53 }
 0x30f   : > { %v2663_v20 = vpop.eup %2662  ;;  %v1789_v21 = vadd.f32 1.0, %v2661_v54  ;;  %v1725_v27 = vmul.f32 1.442695, %v1693_v16  ;;  %v1727_v39 = vmul.f32 1.442695, %v1694_v23 }
 0x310   : > { %v2665_v22 = vpop.eup %2664  ;;  %1838 = vst [vmem:[%s3458_s23 + $0x48] sm:$0xff] %v2663_v20  ;;  %2674 = vrcp.f32 %v1788_v17  ;;  %v1679_v29 = vpop.f32.mrf.mxu2 }
 0x311   : > { %v2667_v24 = vpop.eup %2666  ;;  %2676 = vrcp.f32 %v1789_v21  ;;  %v1790_v25 = vadd.f32 1.0, %v2665_v22  ;;  %v1646_v28 = vpop.f32.mrf.mxu3  ;;  %v1680_v32 = vadd.f32 %v1679_v29, %v3481_v19 }
 0x312   : > { %v2669_v30 = vpop.eup %2668  ;;  %v1794_v31 = vadd.f32 1.0, %v2667_v24  ;;  %2678 = vpow2.f32 %v1763_v18  ;;  %v1647_v42 = vadd.f32 %v1646_v28, %v3467_v43  ;;  %v1643_v33 = vpop.f32.mrf.mxu0 }
 0x313   : > { %v1662_v34 = vpop.f32.mrf.mxu1  ;;  %v2671_v35 = vpop.eup %2670  ;;  %1839 = vst [vmem:[%s3458_s23 + $0x50] sm:$0xff] %v2669_v30  ;;  %2680 = vrcp.f32 %v1790_v25  ;;  %v1644_v36 = vadd.f32 %v1643_v33, %v3467_v43  ;;  %v1695_v41 = vsub.f32 0.0, %v1680_v32 }
 0x314   : > { %v1663_v37 = vadd.f32 %v1662_v34, %v3471_v62  ;;  %v2673_v38 = vpop.eup %2672  ;;  %1843 = vst [vmem:[%s3458_s23 + $0x70] sm:$0xff] %v2671_v35  ;;  %2682 = vrcp.f32 %v1794_v31  ;;  %v1707_v40 = vsub.f32 0.0, %v1647_v42 }
 0x315   : > { %v1795_v44 = vadd.f32 1.0, %v2673_v38  ;;  %2684 = vpow2.f32 %v1765_v26  ;;  %v1700_v45 = vsub.f32 0.0, %v1644_v36  ;;  %v1729_v50 = vmul.f32 1.442695, %v1695_v41 }
 0x316   : > { %v1701_v47 = vsub.f32 0.0, %v1663_v37  ;;  %v2675_v48 = vpop.eup %2674  ;;  %2686 = vpow2.f32 %v1725_v27  ;;  %v1753_v49 = vmul.f32 1.442695, %v1707_v40 }
 0x317   : > { %v2677_v51 = vpop.eup %2676  ;;  %1844 = vst [vmem:[%s3458_s23 + $0x78] sm:$0xff] %v2675_v48  ;;  %2688 = vrcp.f32 %v1795_v44  ;;  %v1739_v55 = vmul.f32 1.442695, %v1700_v45 }
 0x318   : > { %v2679_v52 = vpop.eup %2678  ;;  %1845 = vst [vmem:[%s3458_s23 + $0x80] sm:$0xff] %v2677_v51  ;;  %2690 = vpow2.f32 %v1727_v39  ;;  %v1741_v58 = vmul.f32 1.442695, %v1701_v47  ;;  %v1681_v60 = vpop.f32.mrf.mxu2 }
 0x319   : > { %v2681_v56 = vpop.eup %2680  ;;  %v1796_v57 = vadd.f32 1.0, %v2679_v52  ;;  %2692 = vpow2.f32 %v1753_v49  ;;  %v1648_v59 = vpop.f32.mrf.mxu3  ;;  %v1682_v63 = vadd.f32 %v1681_v60, %v3481_v19 }
 0x31a   : > { %v2683_v61 = vpop.eup %2682  ;;  %1846 = vst [vmem:[%s3458_s23 + $0x88] sm:$0xff] %v2681_v56  ;;  %2694 = vpow2.f32 %v1729_v50  ;;  %v1649_v46 = vadd.f32 %v1648_v59, %v3467_v43  ;;  %v1862_v60 = vpop.permute.xlu0 %1861 }
 0x31b   : > { %v1665_v0 = vpop.f32.mrf.mxu1  ;;  %v2685_v1 = vpop.eup %2684  ;;  %1850 = vst [vmem:[%s3458_s23 + $0xa8] sm:$0xff] %v2683_v61  ;;  %2696 = vrcp.f32 %v1796_v57  ;;  %v1702_v6 = vsub.f32 0.0, %v1682_v63 }
 0x31c   : > { %v1666_v2 = vadd.f32 %v1665_v0, %v3471_v62  ;;  %v2687_v3 = vpop.eup %2686  ;;  %v1797_v4 = vadd.f32 1.0, %v2685_v1  ;;  %2698 = vpow2.f32 %v1739_v55  ;;  %v1714_v5 = vsub.f32 0.0, %v1649_v46  ;;  %v1864_v46 = vpop.permute.xlu1 %1863 }
 0x31d   : > { %v2689_v7 = vpop.eup %2688  ;;  %v1777_v8 = vadd.f32 1.0, %v2687_v3  ;;  %2700 = vpow2.f32 %v1741_v58  ;;  %v1743_v15 = vmul.f32 1.442695, %v1702_v6  ;;  %v1866_v63 = vpop.permute.xlu2 %1865 }
 0x31e   : > { %v2691_v9 = vpop.eup %2690  ;;  %1851 = vst [vmem:[%s3458_s23 + $0xb0] sm:$0xff] %v2689_v7  ;;  %2702 = vrcp.f32 %v1797_v4  ;;  %v1767_v43 = vmul.f32 1.442695, %v1714_v5  ;;  %v1708_v12 = vsub.f32 0.0, %v1666_v2 }
 0x31f   : > { %v2693_v10 = vpop.eup %2692  ;;  %2704 = vrcp.f32 %v1777_v8  ;;  %v1778_v11 = vadd.f32 1.0, %v2691_v9 }
 0x320   : > { %v2695_v13 = vpop.eup %2694  ;;  %v1791_v14 = vadd.f32 1.0, %v2693_v10  ;;  %2706 = vpow2.f32 %v1767_v43  ;;  %v1684_v54 = vpop.f32.mrf.mxu2  ;;  %v1755_v23 = vmul.f32 1.442695, %v1708_v12 }
 0x321   : > { %v2697_v53 = vpop.eup %2696  ;;  %2708 = vrcp.f32 %v1778_v11  ;;  %v1779_v16 = vadd.f32 1.0, %v2695_v13  ;;  %v1685_v18 = vadd.f32 %v1684_v54, %v3481_v19 }
 0x322   : > { %v2699_v17 = vpop.eup %2698  ;;  %1852 = vst [vmem:[%s3458_s23 + $0xb8] sm:$0xff] %v2697_v53  ;;  %2710 = vrcp.f32 %v1791_v14  ;;  %v1868_v0 = vpop.permute.xlu0 %1867 }
 0x323   : > { %v1667_v20 = vpop.f32.mrf.mxu1  ;;  %v2701_v21 = vpop.eup %2700  ;;  %2712 = vrcp.f32 %v1779_v16  ;;  %v1784_v22 = vadd.f32 1.0, %v2699_v17  ;;  %v1709_v27 = vsub.f32 0.0, %v1685_v18 }
 0x324   : > { %v1668_v24 = vadd.f32 %v1667_v20, %v3471_v62  ;;  %v2703_v25 = vpop.eup %2702  ;;  %v1785_v26 = vadd.f32 1.0, %v2701_v21  ;;  %2714 = vpow2.f32 %v1743_v15 }
 0x325   : > { %v2705_v28 = vpop.eup %2704  ;;  %1853 = vst [vmem:[%s3458_s23 + $0xc0] sm:$0xff] %v2703_v25  ;;  %2716 = vrcp.f32 %v1784_v22  ;;  %v1757_v31 = vmul.f32 1.442695, %v1709_v27 }
 0x326   : > { %v1715_v29 = vsub.f32 0.0, %v1668_v24  ;;  %v2707_v30 = vpop.eup %2706  ;;  %1833 = vst [vmem:[%s3458_s23 + $0x20] sm:$0xff] %v2705_v28  ;;  %2718 = vrcp.f32 %v1785_v26 }
 0x327   : > { %v2709_v42 = vpop.eup %2708  ;;  %v1798_v32 = vadd.f32 1.0, %v2707_v30  ;;  %2720 = vpow2.f32 %v1755_v23 }
 0x328   : > { %v1769_v33 = vmul.f32 1.442695, %v1715_v29  ;;  %v2711_v62 = vpop.eup %2710  ;;  %1834 = vst [vmem:[%s3458_s23 + $0x28] sm:$0xff] %v2709_v42  ;;  %2722 = vpow2.f32 %v1757_v31  ;;  %v1686_v35 = vpop.f32.mrf.mxu2 }
 0x329   : > { %v2713_v34 = vpop.eup %2712  ;;  %2724 = vrcp.f32 %v1798_v32  ;;  %v1687_v37 = vadd.f32 %v1686_v35, %v3481_v19  ;;  %1847 = vst [vmem:[%s3458_s23 + $0x90] sm:$0xff] %v2711_v62 }
 0x32a   : > { %v2715_v36 = vpop.eup %2714  ;;  %1835 = vst [vmem:[%s3458_s23 + $0x30] sm:$0xff] %v2713_v34  ;;  %2726 = vpow2.f32 %v1769_v33 }
 0x32b   : > { %v2717_v38 = vpop.eup %2716  ;;  %v1786_v39 = vadd.f32 1.0, %v2715_v36  ;;  %v1716_v41 = vsub.f32 0.0, %v1687_v37  ;;  %1874 = vst.msk [vmem:[%s3458_s23 + $0x30] sm:$0xff] %vm1873_vm0, %v1862_v60 }
 0x32c   : > { %v2719_v40 = vpop.eup %2718  ;;  %1840 = vst [vmem:[%s3458_s23 + $0x58] sm:$0xff] %v2717_v38 }
 0x32d   : > { %v2721_v44 = vpop.eup %2720  ;;  %2728 = vrcp.f32 %v1786_v39  ;;  %1841 = vst [vmem:[%s3458_s23 + $0x60] sm:$0xff] %v2719_v40  ;;  %v1771_v48 = vmul.f32 1.442695, %v1716_v41 }
 0x32e   : > { %v2723_v45 = vpop.eup %2722  ;;  %v1792_v47 = vadd.f32 1.0, %v2721_v44 }
 0x32f   : > { %v2725_v49 = vpop.eup %2724  ;;  %v1793_v50 = vadd.f32 1.0, %v2723_v45 }
 0x330   : > { %v2727_v51 = vpop.eup %2726  ;;  %1854 = vst [vmem:[%s3458_s23 + $0xc8] sm:$0xff] %v2725_v49  ;;  %2730 = vrcp.f32 %v1792_v47 }
 0x331   : > { %2732 = vrcp.f32 %v1793_v50  ;;  %v1799_v19 = vadd.f32 1.0, %v2727_v51 }
 0x332   : > { %2734 = vpow2.f32 %v1771_v48 }
 0x333   : > { %v2729_v52 = vpop.eup %2728  ;;  %2736 = vrcp.f32 %v1799_v19 }
 0x334   : > { %1842 = vst [vmem:[%s3458_s23 + $0x68] sm:$0xff] %v2729_v52 }
 0x335   : > { %1875 = vst.msk [vmem:[%s3458_s23 + $0x68] sm:$0xff] %vm1873_vm0, %v1864_v46 }
 0x336   : > { %v2731_v55 = vpop.eup %2730 }
 0x337   : > { %v2733_v56 = vpop.eup %2732  ;;  %1848 = vst [vmem:[%s3458_s23 + $0x98] sm:$0xff] %v2731_v55 }
 0x338   : > { %v2735_v57 = vpop.eup %2734  ;;  %1849 = vst [vmem:[%s3458_s23 + $0xa0] sm:$0xff] %v2733_v56 }
 0x339   : > { %v2737_v58 = vpop.eup %2736  ;;  %v1800_v59 = vadd.f32 1.0, %v2735_v57  ;;  %1876 = vst.msk [vmem:[%s3458_s23 + $0xa0] sm:$0xff] %vm1873_vm0, %v1866_v63 }
 0x33a   : > { %1855 = vst [vmem:[%s3458_s23 + $0xd0] sm:$0xff] %v2737_v58 }
 0x33b   : > { %2738 = vrcp.f32 %v1800_v59 }
 0x341   : > { %v2739_v61 = vpop.eup %2738 }
 0x342   : > { %1856 = vst [vmem:[%s3458_s23 + $0xd8] sm:$0xff] %v2739_v61 }
 0x343   : > { %1877 = vst.msk [vmem:[%s3458_s23 + $0xd8] sm:$0xff] %vm1873_vm0, %v1868_v0 }
 0x344 PF: > { %s19_s30 = sadd.s32 1, %s2746_s30  }
 0x345   : > { %p16_p4 = scmp.ge.s32.totalorder %s19_s30, 4  }
 0x347   :  { %18 = sbr.rel (!%p16_p4) target bundleno = 1 (0x1), region = 86 }

</bundles_post_ra>
